<compile_context>
chip_gen: v7x
topology: tpu7x:2x2x1
jax: 0.10.0
libtpu: 0.0.40
codegen_flags: <defaults>
</compile_context>

<pallas_src>
import numpy as np
import jax
import jax.numpy as jnp
from jax import lax
from jax.experimental import pallas as pl
from jax.experimental.pallas import tpu as pltpu

LANE = 128


def _round_up(x, m):
    return ((x + m - 1) // m) * m


# ----------------------------------------------------------------------------
# Fused forward kernel (whole network, one pallas_call). Constants via closure.
# ----------------------------------------------------------------------------
def _make_fused_kernel(OH1, colpad1, rows1_pad, lane_stride):
    bf16 = jnp.bfloat16
    f32 = jnp.float32

    def kernel(rgb_ref, ft_ref,
               w1_ref, b1_ref, t2_ref, b2_ref,
               m1_ref, bm1_ref, m2_ref, bm2_ref,
               wp1_ref, bp1_ref, wp2_ref, bp2_ref, wp3_ref, bp3_ref,
               wh1_ref, bh1_ref, wh2_ref, bh2_ref, wh3_ref, bh3_ref,
               whf_ref, bhf_ref,
               out_ref):

        def dense(x, w_ref, b_ref, relu=True, out_dtype=bf16):
            # bf16 MXU operands, f32 accumulate, f32 bias(+ReLU) epilogue.  Results
            # that only feed another matmul are returned in bf16 (halves spill
            # traffic; the next matmul would cast anyway).
            y = jnp.dot(x, w_ref[...], preferred_element_type=f32) + b_ref[...]
            if relu:
                y = jnp.maximum(y, 0.0)
            return y.astype(out_dtype)

        # --- CNN branch -------------------------------------------------------
        # conv1: contraction = true per-output-row receptive field (kh*W*Cin),
        # not a dense HWC Toeplitz.  Each LHS is a contiguous 128-lane-aligned
        # slice of the NHWC-flat rgb tile; all OH1 matmuls share one small RHS.
        parts = []
        for oh in range(OH1):
            lhs = rgb_ref[:, oh * lane_stride: oh * lane_stride + rows1_pad]
            p = jnp.dot(lhs, w1_ref[...], preferred_element_type=f32)
            p = p + b1_ref[:, oh * colpad1:(oh + 1) * colpad1]
            parts.append(jnp.maximum(p, 0.0).astype(bf16))
        h1 = jnp.concatenate(parts, axis=1)              # (tm, OH1*colpad1) bf16
        # conv2 over the oh-blocked conv-1 activation; output is NCHW-flat in
        # columns [0, cnn_dim), zeros elsewhere (ready for the fused concat).
        cnn = dense(h1, t2_ref, b2_ref)

        # --- flat branches (one_hot emb + task_obs), two merged matmuls --------
        # ft lanes: [emb(32)|task].  m1 = [identity | task layer-1];
        # m2 = block-diag second layers placed directly at the concat offsets.
        a1 = dense(ft_ref[...], m1_ref, bm1_ref)
        a2 = dense(a1, m2_ref, bm2_ref)

        # --- modality concat fused as one add (disjoint non-zero lanes) --------
        cat = cnn + a2                                   # [cnn | one_hot | task]

        # --- post_fc_stack -------------------------------------------------------
        x = dense(cat, wp1_ref, bp1_ref)
        x = dense(x, wp2_ref, bp2_ref)
        x = dense(x, wp3_ref, bp3_ref)

        # --- merged logits / value heads (block-diagonal weights) ----------------
        hh = dense(x, wh1_ref, bh1_ref)
        hh = dense(hh, wh2_ref, bh2_ref)
        hh = dense(hh, wh3_ref, bh3_ref)
        y = jnp.dot(hh, whf_ref[...], preferred_element_type=f32) + bhf_ref[...]
        out_ref[...] = y.astype(out_ref.dtype)           # [:, :n]=logits, [:, n]=value

    return kernel


# ----------------------------------------------------------------------------
# Host-side weight preparation
# ----------------------------------------------------------------------------
def _conv1_row_matrix(w1, b1, W_in, s, rows_pad, colpad):
    """Weight of one conv-1 output row over its NHWC-flat receptive-field slice.

    Row index: (i*W_in + w)*Cin + c   (i = kernel row, w = input col, c = channel)
    Col index: ow*Cout + co           (NHWC within the output row), padded.
    """
    kh, kw, cin, cout = w1.shape
    OW = (W_in - kw) // s + 1
    R = np.zeros((rows_pad, colpad), np.float32)
    bias = np.zeros((colpad,), np.float32)
    for ow in range(OW):
        for co in range(cout):
            col = ow * cout + co
            bias[col] = b1[co]
            for i in range(kh):
                for j in range(kw):
                    for c in range(cin):
                        R[(i * W_in + ow * s + j) * cin + c, col] = w1[i, j, c, co]
    return R, bias


def _conv2_matrix(w2, b2, OH1, OW1, s, colpad1, colpad_out):
    """conv-2 as one matmul over the oh-blocked conv-1 activation; NCHW-flat output."""
    kh, kw, cin, cout = w2.shape
    OH2 = (OH1 - kh) // s + 1
    OW2 = (OW1 - kw) // s + 1
    T = np.zeros((OH1 * colpad1, colpad_out), np.float32)
    bias = np.zeros((colpad_out,), np.float32)
    for co in range(cout):
        for oh2 in range(OH2):
            for ow2 in range(OW2):
                col = (co * OH2 + oh2) * OW2 + ow2        # torch NCHW flatten order
                bias[col] = b2[co]
                for i in range(kh):
                    for j in range(kw):
                        for c in range(cin):
                            g = (oh2 * s + i) * colpad1 + (ow2 * s + j) * cin + c
                            T[g, col] = w2[i, j, c, co]
    return T, bias


def _pad2(w, rows, cols):
    out = np.zeros((rows, cols), np.float32)
    out[: w.shape[0], : w.shape[1]] = w
    return out


def _init_linear(key, fan_in, fan_out):
    kw_, kb_ = jax.random.split(key)
    scale = 1.0 / np.sqrt(float(fan_in))
    w = jax.random.uniform(kw_, (fan_in, fan_out), jnp.float32, -scale, scale)
    b = jax.random.uniform(kb_, (fan_out,), jnp.float32, -scale, scale)
    return np.asarray(w), np.asarray(b)


def _init_conv(key, kh, kw, cin, cout):
    w, b = _init_linear(key, kh * kw * cin, cout)
    return w.reshape(kh, kw, cin, cout), b


# ----------------------------------------------------------------------------
# Model
# ----------------------------------------------------------------------------
class ComplexInputNetworkPallas:
    """JAX/Pallas port of ComplexInputNetwork's forward pass.

    Modalities implemented: image 'rgb' (-> CNN), Discrete 'one_hot' (-> one-hot/FC
    stack, realized as embedding gather + FC), flat 'task_obs' (-> flatten + FC).
    Features are concatenated [cnn, one_hot, task_obs], pushed through
    post_fc_stack, then logits_head / value_head ([128,128,128], relu), mirroring
    the torch forward().
    """

    CONV_FILTERS = [(8, 4, 2), (16, 4, 2)]  # (out_channels, kernel, stride)
    FCNET_HIDDENS = [32, 32]
    POST_FCNET_HIDDENS = [128, 128, 128]

    def __init__(self, obs_space, num_outputs, key):
        assert len(self.CONV_FILTERS) == 2 and self.FCNET_HIDDENS == [32, 32]
        self.num_outputs = num_outputs
        keys = iter(jax.random.split(key, 64))
        bf16 = jnp.bfloat16

        # --- CNN for 'rgb' (NCHW obs) -------------------------------------------
        c, h, w = obs_space["rgb"]
        (c1, k1, s1), (c2, k2, s2) = self.CONV_FILTERS
        w1, b1 = _init_conv(next(keys), k1, k1, c, c1)
        w2, b2 = _init_conv(next(keys), k2, k2, c1, c2)
        oh1 = (h - k1) // s1 + 1
        ow1 = (w - k1) // s1 + 1
        oh2 = (oh1 - k2) // s2 + 1
        ow2 = (ow1 - k2) // s2 + 1
        self.s1, self.s2 = s1, s2
        self.OH1 = oh1
        self.rows1_pad = _round_up(k1 * w * c, LANE)     # one output row's receptive field
        self.lane_stride = s1 * w * c                    # lane offset between output rows
        self.colpad1 = _round_up(ow1 * c1, LANE)
        self.rgb_dim = c * h * w
        self.rgb_pad = max(_round_up(self.rgb_dim, LANE),
                           _round_up((oh1 - 1) * self.lane_stride + self.rows1_pad, LANE))
        self.cnn_dim = c2 * oh2 * ow2                    # NCHW-flat CNN feature size

        t1m, b1r = _conv1_row_matrix(w1, b1, w, s1, self.rows1_pad, self.colpad1)
        b1cat = np.zeros((oh1 * self.colpad1,), np.float32)
        for r in range(oh1):
            b1cat[r * self.colpad1:(r + 1) * self.colpad1] = b1r

        # --- FC stack for Discrete 'one_hot' (layer 1 = embedding gather in glue) -
        self.one_hot_n = int(obs_space["one_hot"])
        woh1, boh1 = _init_linear(next(keys), self.one_hot_n, 32)
        woh2, boh2 = _init_linear(next(keys), 32, 32)
        self.emb_w = jnp.asarray(woh1)
        self.emb_b = jnp.asarray(boh1)

        # --- FC stack for flat 'task_obs' ------------------------------------------
        self.task_dim = int(np.prod(obs_space["task_obs"]))
        wt1, bt1 = _init_linear(next(keys), self.task_dim, 32)
        wt2, bt2 = _init_linear(next(keys), 32, 32)
        assert 32 + self.task_dim <= LANE, "flat-branch lane packing assumes emb+task <= 128"
        self.fc_pad = LANE

        # TODO(synk): 'scene_graph' (PyG hetero/homogeneous GNN over ragged graphs)
        # and 'object_set' (TransformerModel over ragged token sets) have no clean
        # Pallas equivalent; omitted.

        concat_size = self.cnn_dim + 32 + 32
        self.post_in_pad = _round_up(concat_size, LANE)

        t2m, b2r = _conv2_matrix(w2, b2, oh1, ow1, s2, self.colpad1, self.post_in_pad)

        # merged flat layer A: [emb | task] -> [emb (identity passthrough) | task h1]
        m1 = np.zeros((self.fc_pad, LANE), np.float32)
        m1[0:32, 0:32] = np.eye(32, dtype=np.float32)
        m1[32:32 + self.task_dim, 32:64] = wt1
        bm1 = np.zeros((LANE,), np.float32)
        bm1[32:64] = bt1
        # merged flat layer B: second FC layers, outputs placed at the concat offsets
        m2 = np.zeros((LANE, self.post_in_pad), np.float32)
        m2[0:32, self.cnn_dim:self.cnn_dim + 32] = woh2
        m2[32:64, self.cnn_dim + 32:self.cnn_dim + 64] = wt2
        bm2 = np.zeros((self.post_in_pad,), np.float32)
        bm2[self.cnn_dim:self.cnn_dim + 32] = boh2
        bm2[self.cnn_dim + 32:self.cnn_dim + 64] = bt2

        # --- post_fc_stack -----------------------------------------------------------
        post, d = [], concat_size
        for hdim in self.POST_FCNET_HIDDENS:
            post.append(_init_linear(next(keys), d, hdim))
            d = hdim
        post_out = d                                     # 128
        wp1 = _pad2(post[0][0], self.post_in_pad, post_out)

        # --- logits_head / value_head (merged, block-diagonal) ------------------------
        def head(out_dim):
            layers, dd = [], post_out
            for hdim in self.POST_FCNET_HIDDENS:
                layers.append(_init_linear(next(keys), dd, hdim))
                dd = hdim
            layers.append(_init_linear(next(keys), dd, out_dim))
            return layers

        lh = head(num_outputs)
        vh = head(1)
        HW = post_out

        def blockdiag(a, bmat):
            out = np.zeros((a.shape[0] + bmat.shape[0], a.shape[1] + bmat.shape[1]),
                           np.float32)
            out[: a.shape[0], : a.shape[1]] = a
            out[a.shape[0]:, a.shape[1]:] = bmat
            return out

        wh1 = np.concatenate([lh[0][0], vh[0][0]], axis=1)         # shared input
        bh1 = np.concatenate([lh[0][1], vh[0][1]])
        wh2 = blockdiag(lh[1][0], vh[1][0]); bh2 = np.concatenate([lh[1][1], vh[1][1]])
        wh3 = blockdiag(lh[2][0], vh[2][0]); bh3 = np.concatenate([lh[2][1], vh[2][1]])

        self.head_pad = _round_up(num_outputs + 1, LANE)
        whf = np.zeros((2 * HW, self.head_pad), np.float32)
        whf[:HW, :num_outputs] = lh[3][0]
        whf[HW:, num_outputs:num_outputs + 1] = vh[3][0]
        bhf = np.zeros((self.head_pad,), np.float32)
        bhf[:num_outputs] = lh[3][1]
        bhf[num_outputs] = vh[3][1][0]

        # --- pack: matrices bf16 (MXU operands), biases f32 (1, n) --------------------
        def W(x):
            return jnp.asarray(x, bf16)

        def Bv(x):
            return jnp.asarray(np.asarray(x, np.float32).reshape(1, -1), jnp.float32)

        self._weights = (
            W(t1m), Bv(b1cat),
            W(t2m), Bv(b2r),
            W(m1), Bv(bm1),
            W(m2), Bv(bm2),
            W(wp1), Bv(post[0][1]),
            W(post[1][0]), Bv(post[1][1]),
            W(post[2][0]), Bv(post[2][1]),
            W(wh1), Bv(bh1),
            W(wh2), Bv(bh2),
            W(wh3), Bv(bh3),
            W(whf), Bv(bhf),
        )

        # raw (f32) parameters kept only for the pure-JAX reference check
        self._raw = dict(
            w1=jnp.asarray(w1), b1=jnp.asarray(b1),
            w2=jnp.asarray(w2), b2=jnp.asarray(b2),
            woh1=jnp.asarray(woh1), boh1=jnp.asarray(boh1),
            woh2=jnp.asarray(woh2), boh2=jnp.asarray(boh2),
            wt1=jnp.asarray(wt1), bt1=jnp.asarray(bt1),
            wt2=jnp.asarray(wt2), bt2=jnp.asarray(bt2),
            post=[(jnp.asarray(a), jnp.asarray(b)) for a, b in post],
            lh=[(jnp.asarray(a), jnp.asarray(b)) for a, b in lh],
            vh=[(jnp.asarray(a), jnp.asarray(b)) for a, b in vh],
        )

        self._kernel = _make_fused_kernel(self.OH1, self.colpad1, self.rows1_pad,
                                          self.lane_stride)
        self._value_out = None
        self._forward_jit = jax.jit(self._forward_impl)

    # --------------------------------------------------------------------------
    def _forward_impl(self, weights, emb_w, emb_b, rgb, one_hot_idx, task_obs):
        B = rgb.shape[0]
        Bp8 = _round_up(max(B, 1), 8)
        # M-tile: up to 256 rows (fills the 256-wide MXU on v6e/v7x); once the
        # padded batch exceeds one 8-row tile, force >=2 grid steps so the single
        # "parallel" axis shards across v7x's two TensorCores.
        if Bp8 <= 8:
            tm = Bp8
        else:
            tm = min(256, _round_up((Bp8 + 1) // 2, 8))
        Bp = _round_up(Bp8, tm)

        # rgb: NCHW -> NHWC flatten so every conv-1 output row's receptive field is
        # one contiguous, 128-lane-aligned slice inside the kernel.  bf16 input DMA.
        x = jnp.transpose(rgb, (0, 2, 3, 1)).reshape(B, -1).astype(jnp.bfloat16)
        x = jnp.pad(x, ((0, Bp - B), (0, self.rgb_pad - x.shape[1])))

        # one_hot: first FC layer == embedding row gather (+bias, ReLU) done here;
        # lane-concatenated with task_obs so both flat branches ride one bf16 input.
        emb = jnp.maximum(jnp.take(emb_w, one_hot_idx.astype(jnp.int32), axis=0) + emb_b,
                          0.0)
        t = task_obs.reshape(B, -1)
        ft = jnp.concatenate([emb, t], axis=1).astype(jnp.bfloat16)
        ft = jnp.pad(ft, ((0, Bp - B), (0, self.fc_pad - ft.shape[1])))

        act_specs = [
            pl.BlockSpec((tm, self.rgb_pad), lambda i: (i, 0)),
            pl.BlockSpec((tm, self.fc_pad), lambda i: (i, 0)),
        ]
        # Weights: full blocks, constant index_map -> DMA'd once, stay VMEM-resident
        # across the grid (same block index => no re-copy).  Total weight set is
        # ~0.85 MiB bf16, so default buffering is well within the VMEM budget.
        w_specs = [pl.BlockSpec(wt.shape, lambda i: (0, 0)) for wt in weights]

        out = pl.pallas_call(
            self._kernel,
            grid=(Bp // tm,),
            in_specs=act_specs + w_specs,
            out_specs=pl.BlockSpec((tm, self.head_pad), lambda i: (i, 0)),
            out_shape=jax.ShapeDtypeStruct((Bp, self.head_pad), jnp.float32),
            compiler_params=pltpu.CompilerParams(
                dimension_semantics=("parallel",)),
        )(x, ft, *weights)

        logits = out[:B, : self.num_outputs]
        values = out[:B, self.num_outputs]
        return logits, values

    # --------------------------------------------------------------------------
    def forward(self, input_dict):
        obs = input_dict["obs"]
        logits, values = self._forward_jit(
            self._weights, self.emb_w, self.emb_b,
            obs["rgb"], obs["one_hot"], obs["task_obs"])
        self._value_out = values
        return logits, []

    def value_function(self):
        return self._value_out

    # --------------------------------------------------------------------------
    def reference_forward(self, rgb, one_hot_idx, task_obs):
        """Pure-JAX f32 reference of the same math (validates the conv lowering,
        lane packing and branch/head merges)."""
        r = self._raw
        dn = ("NCHW", "HWIO", "NCHW")
        x = rgb.astype(jnp.float32)
        hcv = lax.conv_general_dilated(x, r["w1"], (self.s1, self.s1), "VALID",
                                       dimension_numbers=dn)
        hcv = jnp.maximum(hcv + r["b1"].reshape(1, -1, 1, 1), 0.0)
        hcv = lax.conv_general_dilated(hcv, r["w2"], (self.s2, self.s2), "VALID",
                                       dimension_numbers=dn)
        hcv = jnp.maximum(hcv + r["b2"].reshape(1, -1, 1, 1), 0.0)
        cnn = hcv.reshape(hcv.shape[0], -1)                       # NCHW flatten

        oh = jax.nn.one_hot(one_hot_idx, self.one_hot_n, dtype=jnp.float32)
        oh = jnp.maximum(oh @ r["woh1"] + r["boh1"], 0.0)
        oh = jnp.maximum(oh @ r["woh2"] + r["boh2"], 0.0)

        t = task_obs.reshape(task_obs.shape[0], -1).astype(jnp.float32)
        t = jnp.maximum(t @ r["wt1"] + r["bt1"], 0.0)
        t = jnp.maximum(t @ r["wt2"] + r["bt2"], 0.0)

        feat = jnp.concatenate([cnn, oh, t], axis=1)
        for wgt, bias in r["post"]:
            feat = jnp.maximum(feat @ wgt + bias, 0.0)

        l = feat
        for wgt, bias in r["lh"][:-1]:
            l = jnp.maximum(l @ wgt + bias, 0.0)
        wgt, bias = r["lh"][-1]
        logits = l @ wgt + bias

        v = feat
        for wgt, bias in r["vh"][:-1]:
            v = jnp.maximum(v @ wgt + bias, 0.0)
        wgt, bias = r["vh"][-1]
        values = (v @ wgt + bias).reshape(-1)
        return logits, values


# ----------------------------------------------------------------------------
if __name__ == "__main__":
    key = jax.random.PRNGKey(0)
    k_rgb, k_oh, k_task = jax.random.split(key, 3)

    B = 2
    rgb = jax.random.normal(k_rgb, (B, 4, 16, 16), jnp.float32)        # NCHW
    one_hot_idx = jax.random.randint(k_oh, (B,), 0, 6, jnp.int32)       # Discrete(6)
    task_obs = jax.random.normal(k_task, (B, 10), jnp.float32)          # flat obs

    model = ComplexInputNetworkPallas(
        obs_space={"rgb": (4, 16, 16), "one_hot": 6, "task_obs": (10,)},
        num_outputs=7,
        key=jax.random.PRNGKey(42),
    )

    logits, state = model.forward(
        {"obs": {"rgb": rgb, "one_hot": one_hot_idx, "task_obs": task_obs}}
    )
    values = model.value_function()

    jax.block_until_ready(logits)
    jax.block_until_ready(values)

    assert logits.shape == (B, 7), logits.shape
    assert values.shape == (B,), values.shape
    assert state == []

    # Tolerance check vs. an f32 pure-JAX reference (bf16 MXU operands in-kernel).
    ref_logits, ref_values = model.reference_forward(rgb, one_hot_idx, task_obs)
    np.testing.assert_allclose(np.asarray(logits), np.asarray(ref_logits),
                               atol=2e-2, rtol=2e-2)
    np.testing.assert_allclose(np.asarray(values), np.asarray(ref_values),
                               atol=2e-2, rtol=2e-2)

    print("KERNEL_OK")
</pallas_src>

<mosaic_0001>
module attributes {stable_mosaic.version = 11 : i64} {
  func.func @kernel(%arg0: i32, %arg1: memref<8x1024xbf16, #tpu.memory_space<vmem>>, %arg2: memref<8x128xbf16, #tpu.memory_space<vmem>>, %arg3: memref<256x128xbf16, #tpu.memory_space<vmem>>, %arg4: memref<1x896xf32, #tpu.memory_space<vmem>>, %arg5: memref<896x128xbf16, #tpu.memory_space<vmem>>, %arg6: memref<1x128xf32, #tpu.memory_space<vmem>>, %arg7: memref<128x128xbf16, #tpu.memory_space<vmem>>, %arg8: memref<1x128xf32, #tpu.memory_space<vmem>>, %arg9: memref<128x128xbf16, #tpu.memory_space<vmem>>, %arg10: memref<1x128xf32, #tpu.memory_space<vmem>>, %arg11: memref<128x128xbf16, #tpu.memory_space<vmem>>, %arg12: memref<1x128xf32, #tpu.memory_space<vmem>>, %arg13: memref<128x128xbf16, #tpu.memory_space<vmem>>, %arg14: memref<1x128xf32, #tpu.memory_space<vmem>>, %arg15: memref<128x128xbf16, #tpu.memory_space<vmem>>, %arg16: memref<1x128xf32, #tpu.memory_space<vmem>>, %arg17: memref<128x256xbf16, #tpu.memory_space<vmem>>, %arg18: memref<1x256xf32, #tpu.memory_space<vmem>>, %arg19: memref<256x256xbf16, #tpu.memory_space<vmem>>, %arg20: memref<1x256xf32, #tpu.memory_space<vmem>>, %arg21: memref<256x256xbf16, #tpu.memory_space<vmem>>, %arg22: memref<1x256xf32, #tpu.memory_space<vmem>>, %arg23: memref<256x128xbf16, #tpu.memory_space<vmem>>, %arg24: memref<1x128xf32, #tpu.memory_space<vmem>>, %arg25: memref<8x128xf32, #tpu.memory_space<vmem>>) attributes {dimension_semantics = [#tpu.dimension_semantics<parallel>], iteration_bounds = array<i64: 1>, scalar_prefetch = 0 : i64, scratch_operands = 0 : i64, tpu.core_type = #tpu.core_type<tc>, window_params = [{transform_indices = @transform_0, window_bounds = array<i64: 8, 1024>}, {transform_indices = @transform_1, window_bounds = array<i64: 8, 128>}, {pipeline_mode = #tpu.pipeline_mode<synchronous>, transform_indices = @transform_2, window_bounds = array<i64: 256, 128>}, {pipeline_mode = #tpu.pipeline_mode<synchronous>, transform_indices = @transform_3, window_bounds = array<i64: 1, 896>}, {pipeline_mode = #tpu.pipeline_mode<synchronous>, transform_indices = @transform_4, window_bounds = array<i64: 896, 128>}, {pipeline_mode = #tpu.pipeline_mode<synchronous>, transform_indices = @transform_5, window_bounds = array<i64: 1, 128>}, {pipeline_mode = #tpu.pipeline_mode<synchronous>, transform_indices = @transform_6, window_bounds = array<i64: 128, 128>}, {pipeline_mode = #tpu.pipeline_mode<synchronous>, transform_indices = @transform_7, window_bounds = array<i64: 1, 128>}, {pipeline_mode = #tpu.pipeline_mode<synchronous>, transform_indices = @transform_8, window_bounds = array<i64: 128, 128>}, {pipeline_mode = #tpu.pipeline_mode<synchronous>, transform_indices = @transform_9, window_bounds = array<i64: 1, 128>}, {pipeline_mode = #tpu.pipeline_mode<synchronous>, transform_indices = @transform_10, window_bounds = array<i64: 128, 128>}, {pipeline_mode = #tpu.pipeline_mode<synchronous>, transform_indices = @transform_11, window_bounds = array<i64: 1, 128>}, {pipeline_mode = #tpu.pipeline_mode<synchronous>, transform_indices = @transform_12, window_bounds = array<i64: 128, 128>}, {pipeline_mode = #tpu.pipeline_mode<synchronous>, transform_indices = @transform_13, window_bounds = array<i64: 1, 128>}, {pipeline_mode = #tpu.pipeline_mode<synchronous>, transform_indices = @transform_14, window_bounds = array<i64: 128, 128>}, {pipeline_mode = #tpu.pipeline_mode<synchronous>, transform_indices = @transform_15, window_bounds = array<i64: 1, 128>}, {pipeline_mode = #tpu.pipeline_mode<synchronous>, transform_indices = @transform_16, window_bounds = array<i64: 128, 256>}, {pipeline_mode = #tpu.pipeline_mode<synchronous>, transform_indices = @transform_17, window_bounds = array<i64: 1, 256>}, {pipeline_mode = #tpu.pipeline_mode<synchronous>, transform_indices = @transform_18, window_bounds = array<i64: 256, 256>}, {pipeline_mode = #tpu.pipeline_mode<synchronous>, transform_indices = @transform_19, window_bounds = array<i64: 1, 256>}, {pipeline_mode = #tpu.pipeline_mode<synchronous>, transform_indices = @transform_20, window_bounds = array<i64: 256, 256>}, {pipeline_mode = #tpu.pipeline_mode<synchronous>, transform_indices = @transform_21, window_bounds = array<i64: 1, 256>}, {pipeline_mode = #tpu.pipeline_mode<synchronous>, transform_indices = @transform_22, window_bounds = array<i64: 256, 128>}, {pipeline_mode = #tpu.pipeline_mode<synchronous>, transform_indices = @transform_23, window_bounds = array<i64: 1, 128>}, {transform_indices = @transform_24, window_bounds = array<i64: 8, 128>}]} {
    %c0 = arith.constant 0 : index
    %c0_0 = arith.constant 0 : index
    %0 = vector.load %arg1[%c0, %c0_0] : memref<8x1024xbf16, #tpu.memory_space<vmem>>, vector<8x256xbf16>
    %c0_1 = arith.constant 0 : index
    %c0_2 = arith.constant 0 : index
    %1 = vector.load %arg3[%c0_1, %c0_2] : memref<256x128xbf16, #tpu.memory_space<vmem>>, vector<256x128xbf16>
    %cst = arith.constant dense<0.000000e+00> : vector<8x128xf32>
    %2 = tpu.matmul %0, %1, %cst {dimension_numbers = #tpu.dot_dimension_numbers<[1], [0], [0], [1], [0, 0, 1, 1], [], []>} : vector<8x256xbf16>, vector<256x128xbf16>, vector<8x128xf32> -> vector<8x128xf32>
    %c0_3 = arith.constant 0 : index
    %c0_4 = arith.constant 0 : index
    %3 = vector.load %arg4[%c0_3, %c0_4] : memref<1x896xf32, #tpu.memory_space<vmem>>, vector<1x128xf32>
    %4 = vector.broadcast %3 : vector<1x128xf32> to vector<8x128xf32>
    %5 = arith.addf %2, %4 : vector<8x128xf32>
    %cst_5 = arith.constant 0.000000e+00 : f32
    %6 = vector.broadcast %cst_5 : f32 to vector<8x128xf32>
    %7 = arith.maximumf %5, %6 : vector<8x128xf32>
    %8 = arith.truncf %7 : vector<8x128xf32> to vector<8x128xbf16>
    %c0_6 = arith.constant 0 : index
    %c128 = arith.constant 128 : index
    %9 = vector.load %arg1[%c0_6, %c128] : memref<8x1024xbf16, #tpu.memory_space<vmem>>, vector<8x256xbf16>
    %c0_7 = arith.constant 0 : index
    %c0_8 = arith.constant 0 : index
    %10 = vector.load %arg3[%c0_7, %c0_8] : memref<256x128xbf16, #tpu.memory_space<vmem>>, vector<256x128xbf16>
    %cst_9 = arith.constant dense<0.000000e+00> : vector<8x128xf32>
    %11 = tpu.matmul %9, %10, %cst_9 {dimension_numbers = #tpu.dot_dimension_numbers<[1], [0], [0], [1], [0, 0, 1, 1], [], []>} : vector<8x256xbf16>, vector<256x128xbf16>, vector<8x128xf32> -> vector<8x128xf32>
    %c0_10 = arith.constant 0 : index
    %c128_11 = arith.constant 128 : index
    %12 = vector.load %arg4[%c0_10, %c128_11] : memref<1x896xf32, #tpu.memory_space<vmem>>, vector<1x128xf32>
    %13 = vector.broadcast %12 : vector<1x128xf32> to vector<8x128xf32>
    %14 = arith.addf %11, %13 : vector<8x128xf32>
    %cst_12 = arith.constant 0.000000e+00 : f32
    %15 = vector.broadcast %cst_12 : f32 to vector<8x128xf32>
    %16 = arith.maximumf %14, %15 : vector<8x128xf32>
    %17 = arith.truncf %16 : vector<8x128xf32> to vector<8x128xbf16>
    %c0_13 = arith.constant 0 : index
    %c256 = arith.constant 256 : index
    %18 = vector.load %arg1[%c0_13, %c256] : memref<8x1024xbf16, #tpu.memory_space<vmem>>, vector<8x256xbf16>
    %c0_14 = arith.constant 0 : index
    %c0_15 = arith.constant 0 : index
    %19 = vector.load %arg3[%c0_14, %c0_15] : memref<256x128xbf16, #tpu.memory_space<vmem>>, vector<256x128xbf16>
    %cst_16 = arith.constant dense<0.000000e+00> : vector<8x128xf32>
    %20 = tpu.matmul %18, %19, %cst_16 {dimension_numbers = #tpu.dot_dimension_numbers<[1], [0], [0], [1], [0, 0, 1, 1], [], []>} : vector<8x256xbf16>, vector<256x128xbf16>, vector<8x128xf32> -> vector<8x128xf32>
    %c0_17 = arith.constant 0 : index
    %c256_18 = arith.constant 256 : index
    %21 = vector.load %arg4[%c0_17, %c256_18] : memref<1x896xf32, #tpu.memory_space<vmem>>, vector<1x128xf32>
    %22 = vector.broadcast %21 : vector<1x128xf32> to vector<8x128xf32>
    %23 = arith.addf %20, %22 : vector<8x128xf32>
    %cst_19 = arith.constant 0.000000e+00 : f32
    %24 = vector.broadcast %cst_19 : f32 to vector<8x128xf32>
    %25 = arith.maximumf %23, %24 : vector<8x128xf32>
    %26 = arith.truncf %25 : vector<8x128xf32> to vector<8x128xbf16>
    %c0_20 = arith.constant 0 : index
    %c384 = arith.constant 384 : index
    %27 = vector.load %arg1[%c0_20, %c384] : memref<8x1024xbf16, #tpu.memory_space<vmem>>, vector<8x256xbf16>
    %c0_21 = arith.constant 0 : index
    %c0_22 = arith.constant 0 : index
    %28 = vector.load %arg3[%c0_21, %c0_22] : memref<256x128xbf16, #tpu.memory_space<vmem>>, vector<256x128xbf16>
    %cst_23 = arith.constant dense<0.000000e+00> : vector<8x128xf32>
    %29 = tpu.matmul %27, %28, %cst_23 {dimension_numbers = #tpu.dot_dimension_numbers<[1], [0], [0], [1], [0, 0, 1, 1], [], []>} : vector<8x256xbf16>, vector<256x128xbf16>, vector<8x128xf32> -> vector<8x128xf32>
    %c0_24 = arith.constant 0 : index
    %c384_25 = arith.constant 384 : index
    %30 = vector.load %arg4[%c0_24, %c384_25] : memref<1x896xf32, #tpu.memory_space<vmem>>, vector<1x128xf32>
    %31 = vector.broadcast %30 : vector<1x128xf32> to vector<8x128xf32>
    %32 = arith.addf %29, %31 : vector<8x128xf32>
    %cst_26 = arith.constant 0.000000e+00 : f32
    %33 = vector.broadcast %cst_26 : f32 to vector<8x128xf32>
    %34 = arith.maximumf %32, %33 : vector<8x128xf32>
    %35 = arith.truncf %34 : vector<8x128xf32> to vector<8x128xbf16>
    %c0_27 = arith.constant 0 : index
    %c512 = arith.constant 512 : index
    %36 = vector.load %arg1[%c0_27, %c512] : memref<8x1024xbf16, #tpu.memory_space<vmem>>, vector<8x256xbf16>
    %c0_28 = arith.constant 0 : index
    %c0_29 = arith.constant 0 : index
    %37 = vector.load %arg3[%c0_28, %c0_29] : memref<256x128xbf16, #tpu.memory_space<vmem>>, vector<256x128xbf16>
    %cst_30 = arith.constant dense<0.000000e+00> : vector<8x128xf32>
    %38 = tpu.matmul %36, %37, %cst_30 {dimension_numbers = #tpu.dot_dimension_numbers<[1], [0], [0], [1], [0, 0, 1, 1], [], []>} : vector<8x256xbf16>, vector<256x128xbf16>, vector<8x128xf32> -> vector<8x128xf32>
    %c0_31 = arith.constant 0 : index
    %c512_32 = arith.constant 512 : index
    %39 = vector.load %arg4[%c0_31, %c512_32] : memref<1x896xf32, #tpu.memory_space<vmem>>, vector<1x128xf32>
    %40 = vector.broadcast %39 : vector<1x128xf32> to vector<8x128xf32>
    %41 = arith.addf %38, %40 : vector<8x128xf32>
    %cst_33 = arith.constant 0.000000e+00 : f32
    %42 = vector.broadcast %cst_33 : f32 to vector<8x128xf32>
    %43 = arith.maximumf %41, %42 : vector<8x128xf32>
    %44 = arith.truncf %43 : vector<8x128xf32> to vector<8x128xbf16>
    %c0_34 = arith.constant 0 : index
    %c640 = arith.constant 640 : index
    %45 = vector.load %arg1[%c0_34, %c640] : memref<8x1024xbf16, #tpu.memory_space<vmem>>, vector<8x256xbf16>
    %c0_35 = arith.constant 0 : index
    %c0_36 = arith.constant 0 : index
    %46 = vector.load %arg3[%c0_35, %c0_36] : memref<256x128xbf16, #tpu.memory_space<vmem>>, vector<256x128xbf16>
    %cst_37 = arith.constant dense<0.000000e+00> : vector<8x128xf32>
    %47 = tpu.matmul %45, %46, %cst_37 {dimension_numbers = #tpu.dot_dimension_numbers<[1], [0], [0], [1], [0, 0, 1, 1], [], []>} : vector<8x256xbf16>, vector<256x128xbf16>, vector<8x128xf32> -> vector<8x128xf32>
    %c0_38 = arith.constant 0 : index
    %c640_39 = arith.constant 640 : index
    %48 = vector.load %arg4[%c0_38, %c640_39] : memref<1x896xf32, #tpu.memory_space<vmem>>, vector<1x128xf32>
    %49 = vector.broadcast %48 : vector<1x128xf32> to vector<8x128xf32>
    %50 = arith.addf %47, %49 : vector<8x128xf32>
    %cst_40 = arith.constant 0.000000e+00 : f32
    %51 = vector.broadcast %cst_40 : f32 to vector<8x128xf32>
    %52 = arith.maximumf %50, %51 : vector<8x128xf32>
    %53 = arith.truncf %52 : vector<8x128xf32> to vector<8x128xbf16>
    %c0_41 = arith.constant 0 : index
    %c768 = arith.constant 768 : index
    %54 = vector.load %arg1[%c0_41, %c768] : memref<8x1024xbf16, #tpu.memory_space<vmem>>, vector<8x256xbf16>
    %c0_42 = arith.constant 0 : index
    %c0_43 = arith.constant 0 : index
    %55 = vector.load %arg3[%c0_42, %c0_43] : memref<256x128xbf16, #tpu.memory_space<vmem>>, vector<256x128xbf16>
    %cst_44 = arith.constant dense<0.000000e+00> : vector<8x128xf32>
    %56 = tpu.matmul %54, %55, %cst_44 {dimension_numbers = #tpu.dot_dimension_numbers<[1], [0], [0], [1], [0, 0, 1, 1], [], []>} : vector<8x256xbf16>, vector<256x128xbf16>, vector<8x128xf32> -> vector<8x128xf32>
    %c0_45 = arith.constant 0 : index
    %c768_46 = arith.constant 768 : index
    %57 = vector.load %arg4[%c0_45, %c768_46] : memref<1x896xf32, #tpu.memory_space<vmem>>, vector<1x128xf32>
    %58 = vector.broadcast %57 : vector<1x128xf32> to vector<8x128xf32>
    %59 = arith.addf %56, %58 : vector<8x128xf32>
    %cst_47 = arith.constant 0.000000e+00 : f32
    %60 = vector.broadcast %cst_47 : f32 to vector<8x128xf32>
    %61 = arith.maximumf %59, %60 : vector<8x128xf32>
    %62 = arith.truncf %61 : vector<8x128xf32> to vector<8x128xbf16>
    %63 = tpu.concatenate %8, %17, %26, %35, %44, %53, %62 in 1 : vector<8x128xbf16>, vector<8x128xbf16>, vector<8x128xbf16>, vector<8x128xbf16>, vector<8x128xbf16>, vector<8x128xbf16>, vector<8x128xbf16> -> vector<8x896xbf16>
    %c0_48 = arith.constant 0 : index
    %c0_49 = arith.constant 0 : index
    %64 = vector.load %arg5[%c0_48, %c0_49] : memref<896x128xbf16, #tpu.memory_space<vmem>>, vector<896x128xbf16>
    %cst_50 = arith.constant dense<0.000000e+00> : vector<8x128xf32>
    %65 = tpu.matmul %63, %64, %cst_50 {dimension_numbers = #tpu.dot_dimension_numbers<[1], [0], [0], [1], [0, 0, 1, 1], [], []>} : vector<8x896xbf16>, vector<896x128xbf16>, vector<8x128xf32> -> vector<8x128xf32>
    %c0_51 = arith.constant 0 : index
    %c0_52 = arith.constant 0 : index
    %66 = vector.load %arg6[%c0_51, %c0_52] : memref<1x128xf32, #tpu.memory_space<vmem>>, vector<1x128xf32>
    %67 = vector.broadcast %66 : vector<1x128xf32> to vector<8x128xf32>
    %68 = arith.addf %65, %67 : vector<8x128xf32>
    %cst_53 = arith.constant 0.000000e+00 : f32
    %69 = vector.broadcast %cst_53 : f32 to vector<8x128xf32>
    %70 = arith.maximumf %68, %69 : vector<8x128xf32>
    %71 = arith.truncf %70 : vector<8x128xf32> to vector<8x128xbf16>
    %c0_54 = arith.constant 0 : index
    %c0_55 = arith.constant 0 : index
    %72 = vector.load %arg2[%c0_54, %c0_55] : memref<8x128xbf16, #tpu.memory_space<vmem>>, vector<8x128xbf16>
    %c0_56 = arith.constant 0 : index
    %c0_57 = arith.constant 0 : index
    %73 = vector.load %arg7[%c0_56, %c0_57] : memref<128x128xbf16, #tpu.memory_space<vmem>>, vector<128x128xbf16>
    %cst_58 = arith.constant dense<0.000000e+00> : vector<8x128xf32>
    %74 = tpu.matmul %72, %73, %cst_58 {dimension_numbers = #tpu.dot_dimension_numbers<[1], [0], [0], [1], [0, 0, 1, 1], [], []>} : vector<8x128xbf16>, vector<128x128xbf16>, vector<8x128xf32> -> vector<8x128xf32>
    %c0_59 = arith.constant 0 : index
    %c0_60 = arith.constant 0 : index
    %75 = vector.load %arg8[%c0_59, %c0_60] : memref<1x128xf32, #tpu.memory_space<vmem>>, vector<1x128xf32>
    %76 = vector.broadcast %75 : vector<1x128xf32> to vector<8x128xf32>
    %77 = arith.addf %74, %76 : vector<8x128xf32>
    %cst_61 = arith.constant 0.000000e+00 : f32
    %78 = vector.broadcast %cst_61 : f32 to vector<8x128xf32>
    %79 = arith.maximumf %77, %78 : vector<8x128xf32>
    %80 = arith.truncf %79 : vector<8x128xf32> to vector<8x128xbf16>
    %c0_62 = arith.constant 0 : index
    %c0_63 = arith.constant 0 : index
    %81 = vector.load %arg9[%c0_62, %c0_63] : memref<128x128xbf16, #tpu.memory_space<vmem>>, vector<128x128xbf16>
    %cst_64 = arith.constant dense<0.000000e+00> : vector<8x128xf32>
    %82 = tpu.matmul %80, %81, %cst_64 {dimension_numbers = #tpu.dot_dimension_numbers<[1], [0], [0], [1], [0, 0, 1, 1], [], []>} : vector<8x128xbf16>, vector<128x128xbf16>, vector<8x128xf32> -> vector<8x128xf32>
    %c0_65 = arith.constant 0 : index
    %c0_66 = arith.constant 0 : index
    %83 = vector.load %arg10[%c0_65, %c0_66] : memref<1x128xf32, #tpu.memory_space<vmem>>, vector<1x128xf32>
    %84 = vector.broadcast %83 : vector<1x128xf32> to vector<8x128xf32>
    %85 = arith.addf %82, %84 : vector<8x128xf32>
    %cst_67 = arith.constant 0.000000e+00 : f32
    %86 = vector.broadcast %cst_67 : f32 to vector<8x128xf32>
    %87 = arith.maximumf %85, %86 : vector<8x128xf32>
    %88 = arith.truncf %87 : vector<8x128xf32> to vector<8x128xbf16>
    %89 = arith.addf %71, %88 : vector<8x128xbf16>
    %c0_68 = arith.constant 0 : index
    %c0_69 = arith.constant 0 : index
    %90 = vector.load %arg11[%c0_68, %c0_69] : memref<128x128xbf16, #tpu.memory_space<vmem>>, vector<128x128xbf16>
    %cst_70 = arith.constant dense<0.000000e+00> : vector<8x128xf32>
    %91 = tpu.matmul %89, %90, %cst_70 {dimension_numbers = #tpu.dot_dimension_numbers<[1], [0], [0], [1], [0, 0, 1, 1], [], []>} : vector<8x128xbf16>, vector<128x128xbf16>, vector<8x128xf32> -> vector<8x128xf32>
    %c0_71 = arith.constant 0 : index
    %c0_72 = arith.constant 0 : index
    %92 = vector.load %arg12[%c0_71, %c0_72] : memref<1x128xf32, #tpu.memory_space<vmem>>, vector<1x128xf32>
    %93 = vector.broadcast %92 : vector<1x128xf32> to vector<8x128xf32>
    %94 = arith.addf %91, %93 : vector<8x128xf32>
    %cst_73 = arith.constant 0.000000e+00 : f32
    %95 = vector.broadcast %cst_73 : f32 to vector<8x128xf32>
    %96 = arith.maximumf %94, %95 : vector<8x128xf32>
    %97 = arith.truncf %96 : vector<8x128xf32> to vector<8x128xbf16>
    %c0_74 = arith.constant 0 : index
    %c0_75 = arith.constant 0 : index
    %98 = vector.load %arg13[%c0_74, %c0_75] : memref<128x128xbf16, #tpu.memory_space<vmem>>, vector<128x128xbf16>
    %cst_76 = arith.constant dense<0.000000e+00> : vector<8x128xf32>
    %99 = tpu.matmul %97, %98, %cst_76 {dimension_numbers = #tpu.dot_dimension_numbers<[1], [0], [0], [1], [0, 0, 1, 1], [], []>} : vector<8x128xbf16>, vector<128x128xbf16>, vector<8x128xf32> -> vector<8x128xf32>
    %c0_77 = arith.constant 0 : index
    %c0_78 = arith.constant 0 : index
    %100 = vector.load %arg14[%c0_77, %c0_78] : memref<1x128xf32, #tpu.memory_space<vmem>>, vector<1x128xf32>
    %101 = vector.broadcast %100 : vector<1x128xf32> to vector<8x128xf32>
    %102 = arith.addf %99, %101 : vector<8x128xf32>
    %cst_79 = arith.constant 0.000000e+00 : f32
    %103 = vector.broadcast %cst_79 : f32 to vector<8x128xf32>
    %104 = arith.maximumf %102, %103 : vector<8x128xf32>
    %105 = arith.truncf %104 : vector<8x128xf32> to vector<8x128xbf16>
    %c0_80 = arith.constant 0 : index
    %c0_81 = arith.constant 0 : index
    %106 = vector.load %arg15[%c0_80, %c0_81] : memref<128x128xbf16, #tpu.memory_space<vmem>>, vector<128x128xbf16>
    %cst_82 = arith.constant dense<0.000000e+00> : vector<8x128xf32>
    %107 = tpu.matmul %105, %106, %cst_82 {dimension_numbers = #tpu.dot_dimension_numbers<[1], [0], [0], [1], [0, 0, 1, 1], [], []>} : vector<8x128xbf16>, vector<128x128xbf16>, vector<8x128xf32> -> vector<8x128xf32>
    %c0_83 = arith.constant 0 : index
    %c0_84 = arith.constant 0 : index
    %108 = vector.load %arg16[%c0_83, %c0_84] : memref<1x128xf32, #tpu.memory_space<vmem>>, vector<1x128xf32>
    %109 = vector.broadcast %108 : vector<1x128xf32> to vector<8x128xf32>
    %110 = arith.addf %107, %109 : vector<8x128xf32>
    %cst_85 = arith.constant 0.000000e+00 : f32
    %111 = vector.broadcast %cst_85 : f32 to vector<8x128xf32>
    %112 = arith.maximumf %110, %111 : vector<8x128xf32>
    %113 = arith.truncf %112 : vector<8x128xf32> to vector<8x128xbf16>
    %c0_86 = arith.constant 0 : index
    %c0_87 = arith.constant 0 : index
    %114 = vector.load %arg17[%c0_86, %c0_87] : memref<128x256xbf16, #tpu.memory_space<vmem>>, vector<128x256xbf16>
    %cst_88 = arith.constant dense<0.000000e+00> : vector<8x256xf32>
    %115 = tpu.matmul %113, %114, %cst_88 {dimension_numbers = #tpu.dot_dimension_numbers<[1], [0], [0], [1], [0, 0, 1, 1], [], []>} : vector<8x128xbf16>, vector<128x256xbf16>, vector<8x256xf32> -> vector<8x256xf32>
    %c0_89 = arith.constant 0 : index
    %c0_90 = arith.constant 0 : index
    %116 = vector.load %arg18[%c0_89, %c0_90] : memref<1x256xf32, #tpu.memory_space<vmem>>, vector<1x256xf32>
    %117 = vector.broadcast %116 : vector<1x256xf32> to vector<8x256xf32>
    %118 = arith.addf %115, %117 : vector<8x256xf32>
    %cst_91 = arith.constant 0.000000e+00 : f32
    %119 = vector.broadcast %cst_91 : f32 to vector<8x256xf32>
    %120 = arith.maximumf %118, %119 : vector<8x256xf32>
    %121 = arith.truncf %120 : vector<8x256xf32> to vector<8x256xbf16>
    %c0_92 = arith.constant 0 : index
    %c0_93 = arith.constant 0 : index
    %122 = vector.load %arg19[%c0_92, %c0_93] : memref<256x256xbf16, #tpu.memory_space<vmem>>, vector<256x256xbf16>
    %cst_94 = arith.constant dense<0.000000e+00> : vector<8x256xf32>
    %123 = tpu.matmul %121, %122, %cst_94 {dimension_numbers = #tpu.dot_dimension_numbers<[1], [0], [0], [1], [0, 0, 1, 1], [], []>} : vector<8x256xbf16>, vector<256x256xbf16>, vector<8x256xf32> -> vector<8x256xf32>
    %c0_95 = arith.constant 0 : index
    %c0_96 = arith.constant 0 : index
    %124 = vector.load %arg20[%c0_95, %c0_96] : memref<1x256xf32, #tpu.memory_space<vmem>>, vector<1x256xf32>
    %125 = vector.broadcast %124 : vector<1x256xf32> to vector<8x256xf32>
    %126 = arith.addf %123, %125 : vector<8x256xf32>
    %cst_97 = arith.constant 0.000000e+00 : f32
    %127 = vector.broadcast %cst_97 : f32 to vector<8x256xf32>
    %128 = arith.maximumf %126, %127 : vector<8x256xf32>
    %129 = arith.truncf %128 : vector<8x256xf32> to vector<8x256xbf16>
    %c0_98 = arith.constant 0 : index
    %c0_99 = arith.constant 0 : index
    %130 = vector.load %arg21[%c0_98, %c0_99] : memref<256x256xbf16, #tpu.memory_space<vmem>>, vector<256x256xbf16>
    %cst_100 = arith.constant dense<0.000000e+00> : vector<8x256xf32>
    %131 = tpu.matmul %129, %130, %cst_100 {dimension_numbers = #tpu.dot_dimension_numbers<[1], [0], [0], [1], [0, 0, 1, 1], [], []>} : vector<8x256xbf16>, vector<256x256xbf16>, vector<8x256xf32> -> vector<8x256xf32>
    %c0_101 = arith.constant 0 : index
    %c0_102 = arith.constant 0 : index
    %132 = vector.load %arg22[%c0_101, %c0_102] : memref<1x256xf32, #tpu.memory_space<vmem>>, vector<1x256xf32>
    %133 = vector.broadcast %132 : vector<1x256xf32> to vector<8x256xf32>
    %134 = arith.addf %131, %133 : vector<8x256xf32>
    %cst_103 = arith.constant 0.000000e+00 : f32
    %135 = vector.broadcast %cst_103 : f32 to vector<8x256xf32>
    %136 = arith.maximumf %134, %135 : vector<8x256xf32>
    %137 = arith.truncf %136 : vector<8x256xf32> to vector<8x256xbf16>
    %c0_104 = arith.constant 0 : index
    %c0_105 = arith.constant 0 : index
    %138 = vector.load %arg23[%c0_104, %c0_105] : memref<256x128xbf16, #tpu.memory_space<vmem>>, vector<256x128xbf16>
    %cst_106 = arith.constant dense<0.000000e+00> : vector<8x128xf32>
    %139 = tpu.matmul %137, %138, %cst_106 {dimension_numbers = #tpu.dot_dimension_numbers<[1], [0], [0], [1], [0, 0, 1, 1], [], []>} : vector<8x256xbf16>, vector<256x128xbf16>, vector<8x128xf32> -> vector<8x128xf32>
    %c0_107 = arith.constant 0 : index
    %c0_108 = arith.constant 0 : index
    %140 = vector.load %arg24[%c0_107, %c0_108] : memref<1x128xf32, #tpu.memory_space<vmem>>, vector<1x128xf32>
    %141 = vector.broadcast %140 : vector<1x128xf32> to vector<8x128xf32>
    %142 = arith.addf %139, %141 : vector<8x128xf32>
    %c0_109 = arith.constant 0 : index
    %c0_110 = arith.constant 0 : index
    %143 = vector.load %arg25[%c0_109, %c0_110] : memref<8x128xf32, #tpu.memory_space<vmem>>, vector<8x128xf32>
    tpu.vector_store %arg25[%c0_109, %c0_110], %142 {strides = array<i32>} : memref<8x128xf32, #tpu.memory_space<vmem>>, vector<8x128xf32>,
    return
  }
  func.func @transform_0(%arg0: i32) -> (i32, i32) {
    %c0_i32 = arith.constant 0 : i32
    %c0_i32_0 = arith.constant 0 : i32
    return %arg0, %c0_i32 : i32, i32
  }
  func.func @transform_1(%arg0: i32) -> (i32, i32) {
    %c0_i32 = arith.constant 0 : i32
    %c0_i32_0 = arith.constant 0 : i32
    return %arg0, %c0_i32 : i32, i32
  }
  func.func @transform_2(%arg0: i32) -> (i32, i32) {
    %c0_i32 = arith.constant 0 : i32
    %c0_i32_0 = arith.constant 0 : i32
    %c0_i32_1 = arith.constant 0 : i32
    return %c0_i32, %c0_i32_0 : i32, i32
  }
  func.func @transform_3(%arg0: i32) -> (i32, i32) {
    %c0_i32 = arith.constant 0 : i32
    %c0_i32_0 = arith.constant 0 : i32
    %c0_i32_1 = arith.constant 0 : i32
    return %c0_i32, %c0_i32_0 : i32, i32
  }
  func.func @transform_4(%arg0: i32) -> (i32, i32) {
    %c0_i32 = arith.constant 0 : i32
    %c0_i32_0 = arith.constant 0 : i32
    %c0_i32_1 = arith.constant 0 : i32
    return %c0_i32, %c0_i32_0 : i32, i32
  }
  func.func @transform_5(%arg0: i32) -> (i32, i32) {
    %c0_i32 = arith.constant 0 : i32
    %c0_i32_0 = arith.constant 0 : i32
    %c0_i32_1 = arith.constant 0 : i32
    return %c0_i32, %c0_i32_0 : i32, i32
  }
  func.func @transform_6(%arg0: i32) -> (i32, i32) {
    %c0_i32 = arith.constant 0 : i32
    %c0_i32_0 = arith.constant 0 : i32
    %c0_i32_1 = arith.constant 0 : i32
    return %c0_i32, %c0_i32_0 : i32, i32
  }
  func.func @transform_7(%arg0: i32) -> (i32, i32) {
    %c0_i32 = arith.constant 0 : i32
    %c0_i32_0 = arith.constant 0 : i32
    %c0_i32_1 = arith.constant 0 : i32
    return %c0_i32, %c0_i32_0 : i32, i32
  }
  func.func @transform_8(%arg0: i32) -> (i32, i32) {
    %c0_i32 = arith.constant 0 : i32
    %c0_i32_0 = arith.constant 0 : i32
    %c0_i32_1 = arith.constant 0 : i32
    return %c0_i32, %c0_i32_0 : i32, i32
  }
  func.func @transform_9(%arg0: i32) -> (i32, i32) {
    %c0_i32 = arith.constant 0 : i32
    %c0_i32_0 = arith.constant 0 : i32
    %c0_i32_1 = arith.constant 0 : i32
    return %c0_i32, %c0_i32_0 : i32, i32
  }
  func.func @transform_10(%arg0: i32) -> (i32, i32) {
    %c0_i32 = arith.constant 0 : i32
    %c0_i32_0 = arith.constant 0 : i32
    %c0_i32_1 = arith.constant 0 : i32
    return %c0_i32, %c0_i32_0 : i32, i32
  }
  func.func @transform_11(%arg0: i32) -> (i32, i32) {
    %c0_i32 = arith.constant 0 : i32
    %c0_i32_0 = arith.constant 0 : i32
    %c0_i32_1 = arith.constant 0 : i32
    return %c0_i32, %c0_i32_0 : i32, i32
  }
  func.func @transform_12(%arg0: i32) -> (i32, i32) {
    %c0_i32 = arith.constant 0 : i32
    %c0_i32_0 = arith.constant 0 : i32
    %c0_i32_1 = arith.constant 0 : i32
    return %c0_i32, %c0_i32_0 : i32, i32
  }
  func.func @transform_13(%arg0: i32) -> (i32, i32) {
    %c0_i32 = arith.constant 0 : i32
    %c0_i32_0 = arith.constant 0 : i32
    %c0_i32_1 = arith.constant 0 : i32
    return %c0_i32, %c0_i32_0 : i32, i32
  }
  func.func @transform_14(%arg0: i32) -> (i32, i32) {
    %c0_i32 = arith.constant 0 : i32
    %c0_i32_0 = arith.constant 0 : i32
    %c0_i32_1 = arith.constant 0 : i32
    return %c0_i32, %c0_i32_0 : i32, i32
  }
  func.func @transform_15(%arg0: i32) -> (i32, i32) {
    %c0_i32 = arith.constant 0 : i32
    %c0_i32_0 = arith.constant 0 : i32
    %c0_i32_1 = arith.constant 0 : i32
    return %c0_i32, %c0_i32_0 : i32, i32
  }
  func.func @transform_16(%arg0: i32) -> (i32, i32) {
    %c0_i32 = arith.constant 0 : i32
    %c0_i32_0 = arith.constant 0 : i32
    %c0_i32_1 = arith.constant 0 : i32
    return %c0_i32, %c0_i32_0 : i32, i32
  }
  func.func @transform_17(%arg0: i32) -> (i32, i32) {
    %c0_i32 = arith.constant 0 : i32
    %c0_i32_0 = arith.constant 0 : i32
    %c0_i32_1 = arith.constant 0 : i32
    return %c0_i32, %c0_i32_0 : i32, i32
  }
  func.func @transform_18(%arg0: i32) -> (i32, i32) {
    %c0_i32 = arith.constant 0 : i32
    %c0_i32_0 = arith.constant 0 : i32
    %c0_i32_1 = arith.constant 0 : i32
    return %c0_i32, %c0_i32_0 : i32, i32
  }
  func.func @transform_19(%arg0: i32) -> (i32, i32) {
    %c0_i32 = arith.constant 0 : i32
    %c0_i32_0 = arith.constant 0 : i32
    %c0_i32_1 = arith.constant 0 : i32
    return %c0_i32, %c0_i32_0 : i32, i32
  }
  func.func @transform_20(%arg0: i32) -> (i32, i32) {
    %c0_i32 = arith.constant 0 : i32
    %c0_i32_0 = arith.constant 0 : i32
    %c0_i32_1 = arith.constant 0 : i32
    return %c0_i32, %c0_i32_0 : i32, i32
  }
  func.func @transform_21(%arg0: i32) -> (i32, i32) {
    %c0_i32 = arith.constant 0 : i32
    %c0_i32_0 = arith.constant 0 : i32
    %c0_i32_1 = arith.constant 0 : i32
    return %c0_i32, %c0_i32_0 : i32, i32
  }
  func.func @transform_22(%arg0: i32) -> (i32, i32) {
    %c0_i32 = arith.constant 0 : i32
    %c0_i32_0 = arith.constant 0 : i32
    %c0_i32_1 = arith.constant 0 : i32
    return %c0_i32, %c0_i32_0 : i32, i32
  }
  func.func @transform_23(%arg0: i32) -> (i32, i32) {
    %c0_i32 = arith.constant 0 : i32
    %c0_i32_0 = arith.constant 0 : i32
    %c0_i32_1 = arith.constant 0 : i32
    return %c0_i32, %c0_i32_0 : i32, i32
  }
  func.func @transform_24(%arg0: i32) -> (i32, i32) {
    %c0_i32 = arith.constant 0 : i32
    %c0_i32_0 = arith.constant 0 : i32
    return %arg0, %c0_i32 : i32, i32
  }
}

</mosaic_0001>

<bundles_post_ra>
// kernel: _forward_impl.1
= control target key start
LH: loop header
LB: loop body
LE: loop exit
PB: predicated region body
PF: predicated region fallthrough
CT: control target
= control target key end

     0   :  { %s4952_s0 = inlined_call_operand.vmem [shape: bf16[8,1024], index: 0, kind: input, shape index: {}]   ;;  %s4953_s1 = inlined_call_operand.vmem [shape: bf16[8,128], index: 1, kind: input, shape index: {}]   ;;  %s4954_s2 = inlined_call_operand.vmem [shape: bf16[256,128], index: 2, kind: input, shape index: {}]   ;;  %s4955_s3 = inlined_call_operand.hbm [shape: f32[1,896], index: 3, kind: input, shape index: {}]   ;;  %s4956_s4 = inlined_call_operand.vmem [shape: bf16[896,128], index: 4, kind: input, shape index: {}]   ;;  %s4957_s5 = inlined_call_operand.vmem [shape: f32[1,128], index: 5, kind: input, shape index: {}]   ;;  %s4958_s6 = inlined_call_operand.hbm [shape: bf16[128,128], index: 6, kind: input, shape index: {}]   ;;  %s4959_s7 = inlined_call_operand.hbm [shape: f32[1,128], index: 7, kind: input, shape index: {}]   ;;  %s4960_s8 = inlined_call_operand.hbm [shape: bf16[128,128], index: 8, kind: input, shape index: {}]   ;;  %s4961_s9 = inlined_call_operand.hbm [shape: f32[1,128], index: 9, kind: input, shape index: {}]   ;;  %s4962_s10 = inlined_call_operand.hbm [shape: bf16[128,128], index: 10, kind: input, shape index: {}]   ;;  %s4963_s11 = inlined_call_operand.hbm [shape: f32[1,128], index: 11, kind: input, shape index: {}]   ;;  %s4964_s12 = inlined_call_operand.vmem [shape: bf16[128,128], index: 12, kind: input, shape index: {}]   ;;  %s4965_s13 = inlined_call_operand.vmem [shape: f32[1,128], index: 13, kind: input, shape index: {}]   ;;  %s4966_s14 = inlined_call_operand.hbm [shape: bf16[128,128], index: 14, kind: input, shape index: {}]   ;;  %s4967_s15 = inlined_call_operand.vmem [shape: f32[1,128], index: 15, kind: input, shape index: {}]   ;;  %s4968_s16 = inlined_call_operand.hbm [shape: bf16[128,256], index: 16, kind: input, shape index: {}]   ;;  %s4969_s17 = inlined_call_operand.vmem [shape: f32[1,256], index: 17, kind: input, shape index: {}]   ;;  %s4970_s18 = inlined_call_operand.vmem [shape: bf16[256,256], index: 18, kind: input, shape index: {}]   ;;  %s4971_s19 = inlined_call_operand.vmem [shape: f32[1,256], index: 19, kind: input, shape index: {}]   ;;  %s4972_s20 = inlined_call_operand.hbm [shape: bf16[256,256], index: 20, kind: input, shape index: {}]   ;;  %s4973_s21 = inlined_call_operand.hbm [shape: f32[1,256], index: 21, kind: input, shape index: {}]   ;;  %s4974_s22 = inlined_call_operand.hbm [shape: bf16[256,128], index: 22, kind: input, shape index: {}]   ;;  %s4975_s23 = inlined_call_operand.hbm [shape: f32[1,128], index: 23, kind: input, shape index: {}]   ;;  %s4976_s24 = inlined_call_operand.vmem [shape: f32[8,128], index: 24, kind: output, shape index: {}]  }
   0x1   :  { %4984 = sst [smem:[#allocation29_spill]] %s4952_s0 }
   0x2   :  { %4985 = sst [smem:[#allocation30_spill]] %s4953_s1 }
   0x3   :  { %4986 = sst [smem:[#allocation31_spill]] %s4954_s2 }
   0x4   :  { %4987 = sst [smem:[#allocation32_spill]] %s4955_s3 }
   0x5   :  { %4988 = sst [smem:[#allocation33_spill]] %s4956_s4 }
   0x6   :  { %4989 = sst [smem:[#allocation34_spill]] %s4957_s5 }
   0x7   :  { %4990 = sst [smem:[#allocation35_spill]] %s4958_s6 }
   0x8   :  { %4991 = sst [smem:[#allocation36_spill]] %s4959_s7 }
   0x9   :  { %4992 = sst [smem:[#allocation37_spill]] %s4960_s8 }
   0xa   :  { %4993 = sst [smem:[#allocation38_spill]] %s4969_s17 }
   0xb   :  { %4994 = sst [smem:[#allocation39_spill]] %s4971_s19 }
   0xc   :  { %4995 = sst [smem:[#allocation40_spill]] %s4976_s24 }
   0xd   :  { %29 = vsyncpa [#allocation3], 0 }
   0xe   :  { %30 = vsyncpa [#allocation5], 0 }
   0xf   :  { %31 = vsyncpa [#allocation8], 0 }
  0x10   :  { %32 = vsyncpa [#allocation11], 0 }
  0x11   :  { %33 = vsyncpa [#allocation14], 0 }
  0x12   :  { %34 = vsyncpa [#allocation17], 0 }
  0x13   :  { %35 = vsyncpa [#allocation20], 0  ;;  %s4025_s5 = smov [#allocation4]   ;;  %s4996_s6 = sld [smem:[#allocation35_spill]] }
  0x14   :  { %s61_s26 = sshll.u32 %s4025_s5, 4  ;;  %s62_s26 = int_to_ptr.vmem [resolvable:$true] %s61_s26 }
  0x19   :  { %s3725_s2 = scalar_lea.hbm %s4996_s6, 1024 }
  0x1a   :  { %p3726_p0 = scmp.ne.s32.totalorder %s4996_s6, %s3725_s2  ;;  %p3729_p1 = scmp.lt.u32.totalorder %s3725_s2, %s4996_s6 }
  0x1c   :  { %p3731_p2 = pnand %p3729_p1, %p3726_p0 }
  0x1e   :  { %3734 = shalt.err (!%p3731_p2)
}
  0x1f   :  { %s3735_s3 = scalar_lea.vmem %s62_s26, 1024  ;;  %p3740_p4 = scmp.lt.s32.totalorder %s62_s26, %s62_s26 }
  0x20   :  { %p3736_p3 = scmp.ne.s32.totalorder %s62_s26, %s3735_s3  ;;  %p3741_p5 = scmp.lt.s32.totalorder %s3735_s3, %s3735_s3 }
  0x22   :  { %p3742_p6 = por %p3741_p5, %p3740_p4 }
  0x24   :  { %p3743_p7 = pnand %p3742_p6, %p3736_p3 }
  0x26   :  { %3746 = shalt.err (!%p3743_p7)
}
  0x27   :  { %s4026_s25 = smov 64   ;;  %s4027_s8 = smov 4  }
  0x28   :  { %67 = dma.hbm_to_vmem [thread:$0]  %s4996_s6, 1024, %s62_s26, [#allocation5], %s4026_s25, %s4026_s25, %s4027_s8  }
  0x29   :  { %s4028_s5 = smov [#allocation7]   ;;  %s4029_s28 = smov [#allocation10]  }
  0x2a   :  { %s83_s27 = sshll.u32 %s4028_s5, 4  ;;  %s105_s2 = sshll.u32 %s4029_s28, 4  ;;  %s84_s27 = int_to_ptr.vmem [resolvable:$true] %s83_s27  ;;  %s106_s2 = int_to_ptr.vmem [resolvable:$true] %s105_s2 }
  0x2b   :  { %s4997_s7 = sld [smem:[#allocation37_spill]] }
  0x31   :  { %s3747_s30 = scalar_lea.hbm %s4997_s7, 1024 }
  0x32   :  { %p3748_p8 = scmp.ne.s32.totalorder %s4997_s7, %s3747_s30  ;;  %p3751_p9 = scmp.lt.u32.totalorder %s3747_s30, %s4997_s7 }
  0x34   :  { %p3753_p10 = pnand %p3751_p9, %p3748_p8 }
  0x36   :  { %3756 = shalt.err (!%p3753_p10)
}
  0x37   :  { %s3757_s26 = scalar_lea.vmem %s84_s27, 1024  ;;  %p3762_p12 = scmp.lt.s32.totalorder %s84_s27, %s84_s27 }
  0x38   :  { %p3758_p11 = scmp.ne.s32.totalorder %s84_s27, %s3757_s26  ;;  %p3763_p13 = scmp.lt.s32.totalorder %s3757_s26, %s3757_s26 }
  0x3a   :  { %p3764_p0 = por %p3763_p13, %p3762_p12 }
  0x3c   :  { %p3765_p1 = pnand %p3764_p0, %p3758_p11 }
  0x3e   :  { %3768 = shalt.err (!%p3765_p1)
}
  0x3f   :  { %89 = dma.hbm_to_vmem [thread:$0]  %s4997_s7, 1024, %s84_s27, [#allocation8], %s4026_s25, %s4026_s25, %s4027_s8  }
  0x40   :  { %s3769_s19 = scalar_lea.hbm %s4962_s10, 1024 }
  0x41   :  { %p3770_p2 = scmp.ne.s32.totalorder %s4962_s10, %s3769_s19  ;;  %p3773_p3 = scmp.lt.u32.totalorder %s3769_s19, %s4962_s10 }
  0x43   :  { %p3775_p4 = pnand %p3773_p3, %p3770_p2 }
  0x45   :  { %3778 = shalt.err (!%p3775_p4)
}
  0x46   :  { %s3779_s0 = scalar_lea.vmem %s106_s2, 1024  ;;  %p3784_p6 = scmp.lt.s32.totalorder %s106_s2, %s106_s2 }
  0x47   :  { %p3780_p5 = scmp.ne.s32.totalorder %s106_s2, %s3779_s0  ;;  %p3785_p7 = scmp.lt.s32.totalorder %s3779_s0, %s3779_s0 }
  0x49   :  { %p3786_p8 = por %p3785_p7, %p3784_p6 }
  0x4b   :  { %p3787_p9 = pnand %p3786_p8, %p3780_p5 }
  0x4d   :  { %3790 = shalt.err (!%p3787_p9)
}
  0x4e   :  { %111 = dma.hbm_to_vmem [thread:$0]  %s4962_s10, 1024, %s106_s2, [#allocation11], %s4026_s25, %s4026_s25, %s4027_s8  }
  0x4f   :  { %s4030_s30 = smov [#allocation13]   ;;  %s3791_s4 = scalar_lea.hbm %s4966_s14, 1024 }
  0x50   :  { %s131_s3 = sshll.u32 %s4030_s30, 4  ;;  %p3792_p10 = scmp.ne.s32.totalorder %s4966_s14, %s3791_s4  ;;  %s132_s3 = int_to_ptr.vmem [resolvable:$true] %s131_s3 }
  0x51   :  { %p3795_p11 = scmp.lt.u32.totalorder %s3791_s4, %s4966_s14 }
  0x53   :  { %p3797_p12 = pnand %p3795_p11, %p3792_p10 }
  0x55   :  { %3800 = shalt.err (!%p3797_p12)
}
  0x56   :  { %s3801_s5 = scalar_lea.vmem %s132_s3, 1024  ;;  %p3806_p0 = scmp.lt.s32.totalorder %s132_s3, %s132_s3 }
  0x57   :  { %p3802_p13 = scmp.ne.s32.totalorder %s132_s3, %s3801_s5  ;;  %p3807_p1 = scmp.lt.s32.totalorder %s3801_s5, %s3801_s5 }
  0x59   :  { %p3808_p2 = por %p3807_p1, %p3806_p0 }
  0x5b   :  { %p3809_p3 = pnand %p3808_p2, %p3802_p13 }
  0x5d   :  { %3812 = shalt.err (!%p3809_p3)
}
  0x5e   :  { %137 = dma.hbm_to_vmem [thread:$0]  %s4966_s14, 1024, %s132_s3, [#allocation14], %s4026_s25, %s4026_s25, %s4027_s8  }
  0x5f   :  { %s4031_s28 = smov [#allocation16]   ;;  %s4032_s0 = smov [#allocation19]  }
  0x60   :  { %s163_s29 = sshll.u32 %s4031_s28, 4  ;;  %s185_s27 = sshll.u32 %s4032_s0, 4  ;;  %s164_s29 = int_to_ptr.vmem [resolvable:$true] %s163_s29  ;;  %s4230_s27 = int_to_ptr.vmem [resolvable:$true] %s185_s27 }
  0x61   :  { %s3813_s26 = scalar_lea.hbm %s4972_s20, 4096 }
  0x62   :  { %p3814_p4 = scmp.ne.s32.totalorder %s4972_s20, %s3813_s26  ;;  %p3817_p5 = scmp.lt.u32.totalorder %s3813_s26, %s4972_s20 }
  0x64   :  { %p3819_p6 = pnand %p3817_p5, %p3814_p4 }
  0x66   :  { %3822 = shalt.err (!%p3819_p6)
}
  0x67   :  { %s3823_s14 = scalar_lea.vmem %s164_s29, 4096  ;;  %p3828_p8 = scmp.lt.s32.totalorder %s164_s29, %s164_s29 }
  0x68   :  { %p3824_p7 = scmp.ne.s32.totalorder %s164_s29, %s3823_s14  ;;  %p3829_p9 = scmp.lt.s32.totalorder %s3823_s14, %s3823_s14 }
  0x6a   :  { %p3830_p10 = por %p3829_p9, %p3828_p8 }
  0x6c   :  { %p3831_p11 = pnand %p3830_p10, %p3824_p7 }
  0x6e   :  { %3834 = shalt.err (!%p3831_p11)
}
  0x6f   :  { %s4033_s3 = smov 128   ;;  %s4034_s19 = smov 8  }
  0x70   :  { %169 = dma.hbm_to_vmem [thread:$0]  %s4972_s20, 4096, %s164_s29, [#allocation17], %s4033_s3, %s4033_s3, %s4034_s19  }
  0x71   :  { %s3835_s28 = scalar_lea.hbm %s4974_s22, 2048 }
  0x72   :  { %p3836_p12 = scmp.ne.s32.totalorder %s4974_s22, %s3835_s28  ;;  %p3839_p13 = scmp.lt.u32.totalorder %s3835_s28, %s4974_s22 }
  0x74   :  { %p3841_p0 = pnand %p3839_p13, %p3836_p12 }
  0x76   :  { %3844 = shalt.err (!%p3841_p0)
}
  0x77   :  { %s3845_s6 = scalar_lea.vmem %s4230_s27, 2048  ;;  %p3850_p2 = scmp.lt.s32.totalorder %s4230_s27, %s4230_s27 }
  0x78   :  { %p3846_p1 = scmp.ne.s32.totalorder %s4230_s27, %s3845_s6  ;;  %p3851_p3 = scmp.lt.s32.totalorder %s3845_s6, %s3845_s6 }
  0x7a   :  { %p3852_p4 = por %p3851_p3, %p3850_p2 }
  0x7c   :  { %p3853_p5 = pnand %p3852_p4, %p3846_p1 }
  0x7e   :  { %3856 = shalt.err (!%p3853_p5)
}
  0x7f   :  { %191 = dma.hbm_to_vmem [thread:$0]  %s4974_s22, 2048, %s4230_s27, [#allocation20], %s4026_s25, %s4026_s25, %s4027_s8  }
  0x80   :  { %s4035_s4 = smov [#allocation2]   ;;  %s4036_s17 = smov [#allocation6]  }
  0x81   :  { %s48_s24 = sshll.u32 %s4035_s4, 4  ;;  %s74_s14 = sshll.u32 %s4036_s17, 4  ;;  %s49_s24 = int_to_ptr.vmem [resolvable:$true] %s48_s24  ;;  %s75_s14 = int_to_ptr.vmem [resolvable:$true] %s74_s14 }
  0x82   :  { %s4998_s10 = sld [smem:[#allocation32_spill]] }
  0x88   :  { %s3857_s2 = scalar_lea.hbm %s4998_s10, 112 }
  0x89   :  { %p3858_p6 = scmp.ne.s32.totalorder %s4998_s10, %s3857_s2  ;;  %p3861_p7 = scmp.lt.u32.totalorder %s3857_s2, %s4998_s10 }
  0x8b   :  { %p3863_p8 = pnand %p3861_p7, %p3858_p6 }
  0x8d   :  { %3866 = shalt.err (!%p3863_p8)
}
  0x8e   :  { %s3867_s22 = scalar_lea.vmem %s49_s24, 112  ;;  %s3871_s25 = scalar_lea.vmem %s49_s24, 128 }
  0x8f   :  { %p3868_p9 = scmp.ne.s32.totalorder %s49_s24, %s3867_s22  ;;  %p3872_p10 = scmp.lt.s32.totalorder %s49_s24, %s49_s24 }
  0x90   :  { %p3873_p11 = scmp.lt.s32.totalorder %s3871_s25, %s3867_s22 }
  0x92   :  { %p3874_p12 = por %p3873_p11, %p3872_p10 }
  0x94   :  { %p3875_p13 = pnand %p3874_p12, %p3868_p9 }
  0x96   :  { %3878 = shalt.err (!%p3875_p13)
}
  0x97   :  { %51 = dma.hbm_to_vmem [thread:$0]  %s4998_s10, 112, %s49_s24, [#allocation3]  }
  0x98   :  { %s4999_s20 = sld [smem:[#allocation36_spill]] }
  0x9e   :  { %s3879_s29 = scalar_lea.hbm %s4999_s20, 16 }
  0x9f   :  { %p3880_p0 = scmp.ne.s32.totalorder %s4999_s20, %s3879_s29  ;;  %p3883_p1 = scmp.lt.u32.totalorder %s3879_s29, %s4999_s20 }
  0xa1   :  { %p3885_p2 = pnand %p3883_p1, %p3880_p0 }
  0xa3   :  { %3888 = shalt.err (!%p3885_p2)
}
  0xa4   :  { %s3889_s2 = scalar_lea.vmem %s75_s14, 16  ;;  %s3893_s28 = scalar_lea.vmem %s75_s14, 32 }
  0xa5   :  { %p3890_p3 = scmp.ne.s32.totalorder %s75_s14, %s3889_s2  ;;  %p3894_p4 = scmp.lt.s32.totalorder %s75_s14, %s75_s14 }
  0xa6   :  { %p3895_p5 = scmp.lt.s32.totalorder %s3893_s28, %s3889_s2 }
  0xa8   :  { %p3896_p6 = por %p3895_p5, %p3894_p4 }
  0xaa   :  { %p3897_p7 = pnand %p3896_p6, %p3890_p3 }
  0xac   :  { %3900 = shalt.err (!%p3897_p7)
}
  0xad   :  { %77 = dma.hbm_to_vmem [thread:$0]  %s4999_s20, 16, %s75_s14, [#allocation5]  }
  0xae   :  { %s4037_s0 = smov [#allocation9]   ;;  %s4038_s30 = smov [#allocation12]  }
  0xaf   :  { %s96_s7 = sshll.u32 %s4037_s0, 4  ;;  %s118_s22 = sshll.u32 %s4038_s30, 4  ;;  %s97_s7 = int_to_ptr.vmem [resolvable:$true] %s96_s7  ;;  %s119_s22 = int_to_ptr.vmem [resolvable:$true] %s118_s22 }
  0xb0   :  { %s3901_s27 = scalar_lea.hbm %s4961_s9, 16 }
  0xb1   :  { %p3902_p8 = scmp.ne.s32.totalorder %s4961_s9, %s3901_s27  ;;  %p3905_p9 = scmp.lt.u32.totalorder %s3901_s27, %s4961_s9 }
  0xb3   :  { %p3907_p10 = pnand %p3905_p9, %p3902_p8 }
  0xb5   :  { %3910 = shalt.err (!%p3907_p10)
}
  0xb6   :  { %s3911_s14 = scalar_lea.vmem %s97_s7, 16  ;;  %s3915_s20 = scalar_lea.vmem %s97_s7, 32 }
  0xb7   :  { %p3912_p11 = scmp.ne.s32.totalorder %s97_s7, %s3911_s14  ;;  %p3916_p12 = scmp.lt.s32.totalorder %s97_s7, %s97_s7 }
  0xb8   :  { %p3917_p13 = scmp.lt.s32.totalorder %s3915_s20, %s3911_s14 }
  0xba   :  { %p3918_p0 = por %p3917_p13, %p3916_p12 }
  0xbc   :  { %p3919_p1 = pnand %p3918_p0, %p3912_p11 }
  0xbe   :  { %3922 = shalt.err (!%p3919_p1)
}
  0xbf   :  { %99 = dma.hbm_to_vmem [thread:$0]  %s4961_s9, 16, %s97_s7, [#allocation8]  }
  0xc0   :  { %s3923_s28 = scalar_lea.hbm %s4963_s11, 16 }
  0xc1   :  { %p3924_p2 = scmp.ne.s32.totalorder %s4963_s11, %s3923_s28  ;;  %p3927_p3 = scmp.lt.u32.totalorder %s3923_s28, %s4963_s11 }
  0xc3   :  { %p3929_p4 = pnand %p3927_p3, %p3924_p2 }
  0xc5   :  { %3932 = shalt.err (!%p3929_p4)
}
  0xc6   :  { %s3933_s25 = scalar_lea.vmem %s119_s22, 16  ;;  %s3937_s8 = scalar_lea.vmem %s119_s22, 32 }
  0xc7   :  { %p3934_p5 = scmp.ne.s32.totalorder %s119_s22, %s3933_s25  ;;  %p3938_p6 = scmp.lt.s32.totalorder %s119_s22, %s119_s22 }
  0xc8   :  { %p3939_p7 = scmp.lt.s32.totalorder %s3937_s8, %s3933_s25 }
  0xca   :  { %p3940_p8 = por %p3939_p7, %p3938_p6 }
  0xcc   :  { %p3941_p9 = pnand %p3940_p8, %p3934_p5 }
  0xce   :  { %3944 = shalt.err (!%p3941_p9)
}
  0xcf   :  { %121 = dma.hbm_to_vmem [thread:$0]  %s4963_s11, 16, %s119_s22, [#allocation11]  }
  0xd0   :  { %s4039_s27 = smov [#allocation15]   ;;  %s4040_s6 = smov [#allocation18]  }
  0xd1   :  { %s145_s26 = sshll.u32 %s4039_s27, 4  ;;  %s176_s29 = sshll.u32 %s4040_s6, 4  ;;  %s146_s26 = int_to_ptr.vmem [resolvable:$true] %s145_s26  ;;  %s177_s29 = int_to_ptr.vmem [resolvable:$true] %s176_s29 }
  0xd2   :  { %s3945_s20 = scalar_lea.hbm %s4968_s16, 2048 }
  0xd3   :  { %p3946_p10 = scmp.ne.s32.totalorder %s4968_s16, %s3945_s20  ;;  %p3949_p11 = scmp.lt.u32.totalorder %s3945_s20, %s4968_s16 }
  0xd5   :  { %p3951_p12 = pnand %p3949_p11, %p3946_p10 }
  0xd7   :  { %3954 = shalt.err (!%p3951_p12)
}
  0xd8   :  { %s3955_s11 = scalar_lea.vmem %s146_s26, 2048  ;;  %p3960_p0 = scmp.lt.s32.totalorder %s146_s26, %s146_s26 }
  0xd9   :  { %p3956_p13 = scmp.ne.s32.totalorder %s146_s26, %s3955_s11  ;;  %p3961_p1 = scmp.lt.s32.totalorder %s3955_s11, %s3955_s11 }
  0xdb   :  { %p3962_p2 = por %p3961_p1, %p3960_p0 }
  0xdd   :  { %p3963_p3 = pnand %p3962_p2, %p3956_p13 }
  0xdf   :  { %3966 = shalt.err (!%p3963_p3)
}
  0xe0   :  { %151 = dma.hbm_to_vmem [thread:$0]  %s4968_s16, 2048, %s146_s26, [#allocation14], %s4033_s3, %s4033_s3, %s4034_s19  }
  0xe1   :  { %s3967_s0 = scalar_lea.hbm %s4973_s21, 32 }
  0xe2   :  { %p3968_p4 = scmp.ne.s32.totalorder %s4973_s21, %s3967_s0  ;;  %p3971_p5 = scmp.lt.u32.totalorder %s3967_s0, %s4973_s21 }
  0xe4   :  { %p3973_p6 = pnand %p3971_p5, %p3968_p4 }
  0xe6   :  { %3976 = shalt.err (!%p3973_p6)
}
  0xe7   :  { %s3977_s7 = scalar_lea.vmem %s177_s29, 32  ;;  %p3982_p8 = scmp.lt.s32.totalorder %s177_s29, %s177_s29 }
  0xe8   :  { %p3978_p7 = scmp.ne.s32.totalorder %s177_s29, %s3977_s7  ;;  %p3983_p9 = scmp.lt.s32.totalorder %s3977_s7, %s3977_s7 }
  0xea   :  { %p3984_p10 = por %p3983_p9, %p3982_p8 }
  0xec   :  { %p3985_p11 = pnand %p3984_p10, %p3978_p7 }
  0xee   :  { %3988 = shalt.err (!%p3985_p11)
}
  0xef   :  { %179 = dma.hbm_to_vmem [thread:$0]  %s4973_s21, 32, %s177_s29, [#allocation17]  }
  0xf0   :  { %s4041_s19 = smov [#allocation21]   ;;  %s3989_s4 = scalar_lea.hbm %s4975_s23, 16 }
  0xf1   :  { %s198_s27 = sshll.u32 %s4041_s19, 4  ;;  %p3990_p12 = scmp.ne.s32.totalorder %s4975_s23, %s3989_s4  ;;  %s199_s27 = int_to_ptr.vmem [resolvable:$true] %s198_s27 }
  0xf2   :  { %p3993_p13 = scmp.lt.u32.totalorder %s3989_s4, %s4975_s23 }
  0xf4   :  { %p3995_p0 = pnand %p3993_p13, %p3990_p12 }
  0xf6   :  { %3998 = shalt.err (!%p3995_p0)
}
  0xf7   :  { %s3999_s5 = scalar_lea.vmem %s199_s27, 16  ;;  %s4003_s21 = scalar_lea.vmem %s199_s27, 32 }
  0xf8   :  { %p4000_p1 = scmp.ne.s32.totalorder %s199_s27, %s3999_s5  ;;  %p4004_p2 = scmp.lt.s32.totalorder %s199_s27, %s199_s27 }
  0xf9   :  { %p4005_p3 = scmp.lt.s32.totalorder %s4003_s21, %s3999_s5 }
  0xfb   :  { %p4006_p4 = por %p4005_p3, %p4004_p2 }
  0xfd   :  { %p4007_p5 = pnand %p4006_p4, %p4000_p1 }
  0xff   :  { %4010 = shalt.err (!%p4007_p5)
}
 0x100   :  { %201 = dma.hbm_to_vmem [thread:$0]  %s4975_s23, 16, %s199_s27, [#allocation20]  }
 0x101   :  { %4011 = dma.done.wait [#allocation3], 112  }
 0x102   :  { %4012 = vsyncadd [#allocation3], 4294967184 }
 0x103   :  { %4013 = dma.done.wait [#allocation5], 1040  }
 0x104   :  { %4014 = vsyncadd [#allocation5], 4294966256 }
 0x105   :  { %4015 = dma.done.wait [#allocation8], 1040  }
 0x106   :  { %4016 = vsyncadd [#allocation8], 4294966256 }
 0x107   :  { %4017 = dma.done.wait [#allocation11], 1040  }
 0x108   :  { %4018 = vsyncadd [#allocation11], 4294966256 }
 0x109   :  { %4019 = dma.done.wait [#allocation14], 3072  }
 0x10a   :  { %4020 = vsyncadd [#allocation14], 4294964224 }
 0x10b   :  { %4021 = dma.done.wait [#allocation17], 4128  }
 0x10c   :  { %4022 = vsyncadd [#allocation17], 4294963168 }
 0x10d   :  { %4023 = dma.done.wait [#allocation20], 2064  }
 0x10e   :  { %4024 = vsyncadd [#allocation20], 4294965232  ;;  %s5000_s28 = sld [smem:[#allocation31_spill]]  ;;  %s5001_s29 = sld [smem:[#allocation29_spill]]  ;;  %vm4043_vm0 = vmmov 0  }
 0x10f   :  { %s5002_s5 = sld [smem:[#allocation33_spill]]  ;;  %s5003_s10 = sld [smem:[#allocation30_spill]] }
 0x110   :  { %s5004_s25 = sld [smem:[#allocation34_spill]]  ;;  %s5005_s0 = sld [smem:[#allocation38_spill]] }
 0x111   :  { %s5006_s8 = sld [smem:[#allocation39_spill]]  ;;  %s5007_s16 = sld [smem:[#allocation40_spill]] }
 0x114   :  { %v4357_v0 = vld [vmem:[%s5000_s28 + $0x40] sm:$0xff]   ;;  %v4369_v2 = vld [vmem:[%s5000_s28 + $0x48] sm:$0xff]   ;;  %v4383_v4 = vld [vmem:[%s5000_s28 + $0x50] sm:$0xff]  }
 0x115   :  { %v4362_v1 = vld [vmem:[%s5000_s28] sm:$0xff]   ;;  %3027 = vmatprep.subr.bf16.mxu0 %v4357_v0  ;;  %3049 = vmatprep.subr.bf16.mxu1 %v4357_v0  ;;  %v4376_v3 = vld [vmem:[%s5000_s28 + $0x8] sm:$0xff]   ;;  %v4390_v5 = vld [vmem:[%s5000_s28 + $0x10] sm:$0xff]  }
 0x116   :  { %3028 = vmatpush3.bf16.msra.mxu0 %v4362_v1  ;;  %3050 = vmatpush3.bf16.msra.mxu1 %v4362_v1  ;;  %v4397_v6 = vld [vmem:[%s5000_s28 + $0x58] sm:$0xff]   ;;  %v4411_v8 = vld [vmem:[%s5000_s28 + $0x60] sm:$0xff]   ;;  %v4425_v10 = vld [vmem:[%s5000_s28 + $0x68] sm:$0xff]  }
 0x117   :  { %3029 = vmatprep.subr.bf16.mxu0 %v4369_v2  ;;  %3051 = vmatprep.subr.bf16.mxu1 %v4369_v2  ;;  %v4404_v7 = vld [vmem:[%s5000_s28 + $0x18] sm:$0xff]   ;;  %v4418_v9 = vld [vmem:[%s5000_s28 + $0x20] sm:$0xff]   ;;  %v4438_v15 = vld [vmem:[%s5000_s28 + $0x28] sm:$0xff]  }
 0x118   :  { %v242_v11 = vld [vmem:[%s5001_s29] sm:$0xff]  ;;  %v4445_v16 = vld [vmem:[%s5000_s28 + $0x70] sm:$0xff]   ;;  %v4459_v18 = vld [vmem:[%s5000_s28 + $0x78] sm:$0xff]  }
 0x119   :  { %v427_v12 = vld [vmem:[%s5001_s29 + $0x4] sm:$0xff]  ;;  %v2793_v13 = vcombine.high %v242_v11, %v242_v11  ;;  %v4452_v17 = vld [vmem:[%s5000_s28 + $0x30] sm:$0xff]   ;;  %v4466_v19 = vld [vmem:[%s5000_s28 + $0x38] sm:$0xff]   ;;  %v2792_v22 = vcombine.low %v242_v11, %v242_v11 }
 0x11a   :  { %3030 = vmatpush3.bf16.msra.mxu0 %v4376_v3  ;;  %3052 = vmatpush3.bf16.msra.mxu1 %v4376_v3  ;;  %v2812_v14 = vcombine.high %v427_v12, %v427_v12  ;;  %v484_v20 = vld [vmem:[%s5001_s29 + $0x8] sm:$0xff]  ;;  %v2811_v23 = vcombine.low %v427_v12, %v427_v12  ;;  %v598_v26 = vld [vmem:[%s5001_s29 + $0x10] sm:$0xff]  ;;  %v4545_v32 = vld [vmem:[%s5001_s29 + $0x18] sm:$0xff] }
 0x11b   :  { %3031 = vmatprep.subr.bf16.mxu0 %v4383_v4  ;;  %3053 = vmatprep.subr.bf16.mxu1 %v4383_v4  ;;  %v541_v21 = vld [vmem:[%s5001_s29 + $0xc] sm:$0xff]  ;;  %v2815_v24 = vcombine.high %v484_v20, %v484_v20  ;;  %v655_v27 = vld [vmem:[%s5001_s29 + $0x14] sm:$0xff]  ;;  %v2814_v28 = vcombine.low %v484_v20, %v484_v20  ;;  %v2821_v30 = vcombine.high %v598_v26, %v598_v26  ;;  %v3493_v33 = vld [vmem:[%s5002_s5 + $0x40] sm:$0xff]  }
 0x11c   :  { %417 = vmatprep.mubr.bf16.mxu0 %v2793_v13  ;;  %474 = vmatprep.mubr.bf16.mxu1 %v2812_v14  ;;  %v2818_v25 = vcombine.high %v541_v21, %v541_v21  ;;  %v2817_v29 = vcombine.low %v541_v21, %v541_v21  ;;  %v2824_v31 = vcombine.high %v655_v27, %v655_v27  ;;  %v3494_v36 = vld [vmem:[%s5002_s5] sm:$0xff]   ;;  %v3495_v38 = vld [vmem:[%s5002_s5 + $0x48] sm:$0xff]   ;;  %v3497_v40 = vld [vmem:[%s5002_s5 + $0x50] sm:$0xff]  }
 0x11d   :  { %v2820_v34 = vcombine.low %v598_v26, %v598_v26  ;;  %v2823_v35 = vcombine.low %v655_v27, %v655_v27  ;;  %v2827_v37 = vcombine.high %v4545_v32, %v4545_v32  ;;  %v3496_v39 = vld [vmem:[%s5002_s5 + $0x8] sm:$0xff]   ;;  %v3498_v41 = vld [vmem:[%s5002_s5 + $0x10] sm:$0xff]   ;;  %v3499_v42 = vld [vmem:[%s5002_s5 + $0x58] sm:$0xff]   ;;  %v2826_v52 = vcombine.low %v4545_v32, %v4545_v32 }
 0x11e   :  { %3032 = vmatpush3.bf16.msra.mxu0 %v4390_v5  ;;  %3054 = vmatpush3.bf16.msra.mxu1 %v4390_v5  ;;  %v3500_v43 = vld [vmem:[%s5002_s5 + $0x18] sm:$0xff]   ;;  %v3501_v44 = vld [vmem:[%s5002_s5 + $0x60] sm:$0xff]   ;;  %v3503_v46 = vld [vmem:[%s5002_s5 + $0x68] sm:$0xff]  }
 0x11f   :  { %3033 = vmatprep.subr.bf16.mxu0 %v4397_v6  ;;  %3055 = vmatprep.subr.bf16.mxu1 %v4397_v6  ;;  %v3502_v45 = vld [vmem:[%s5002_s5 + $0x20] sm:$0xff]   ;;  %v3504_v47 = vld [vmem:[%s5002_s5 + $0x28] sm:$0xff]   ;;  %v3505_v48 = vld [vmem:[%s5002_s5 + $0x70] sm:$0xff]  }
 0x120   :  { %v3506_v49 = vld [vmem:[%s5002_s5 + $0x30] sm:$0xff]   ;;  %v3507_v50 = vld [vmem:[%s5002_s5 + $0x78] sm:$0xff]   ;;  %v3509_v53 = vld [vmem:[%s5002_s5 + $0xc0] sm:$0xff]  }
 0x121   :  { %v3508_v51 = vld [vmem:[%s5002_s5 + $0x38] sm:$0xff]   ;;  %v3510_v54 = vld [vmem:[%s5002_s5 + $0x80] sm:$0xff]   ;;  %v3511_v55 = vld [vmem:[%s5002_s5 + $0xc8] sm:$0xff]  }
 0x122   :  { %3034 = vmatpush3.bf16.msra.mxu0 %v4404_v7  ;;  %3056 = vmatpush3.bf16.msra.mxu1 %v4404_v7  ;;  %v3512_v56 = vld [vmem:[%s5002_s5 + $0x88] sm:$0xff]   ;;  %v3513_v57 = vld [vmem:[%s5002_s5 + $0xd0] sm:$0xff]   ;;  %v3515_v59 = vld [vmem:[%s5002_s5 + $0xd8] sm:$0xff]  }
 0x123   :  { %3035 = vmatprep.subr.bf16.mxu0 %v4411_v8  ;;  %3057 = vmatprep.subr.bf16.mxu1 %v4411_v8  ;;  %v3514_v58 = vld [vmem:[%s5002_s5 + $0x90] sm:$0xff]   ;;  %v3516_v60 = vld [vmem:[%s5002_s5 + $0x98] sm:$0xff]   ;;  %v3517_v61 = vld [vmem:[%s5002_s5 + $0xe0] sm:$0xff]  }
 0x124   :  { %v3518_v62 = vld [vmem:[%s5002_s5 + $0xa0] sm:$0xff]   ;;  %v3519_v63 = vld [vmem:[%s5002_s5 + $0xe8] sm:$0xff]  }
 0x125   :  { %v2810_v11 = vld [vmem:[#allocation2 + $0x1] ss:$0 sm:$0xff]  ;;  %v3527_v26 = vld [vmem:[%s5002_s5 + $0x148] sm:$0xff]  }
 0x126   :  { %3036 = vmatpush3.bf16.msra.mxu0 %v4418_v9  ;;  %3058 = vmatpush3.bf16.msra.mxu1 %v4418_v9  ;;  %v3528_v27 = vld [vmem:[%s5002_s5 + $0x108] sm:$0xff]   ;;  %v3533_v32 = vld [vmem:[%s5002_s5 + $0x160] sm:$0xff]  }
 0x127   :  { %3037 = vmatprep.subr.bf16.mxu0 %v4425_v10  ;;  %3059 = vmatprep.subr.bf16.mxu1 %v4425_v10 }
 0x12a   :  { %3038 = vmatpush3.bf16.msra.mxu0 %v4438_v15  ;;  %3060 = vmatpush3.bf16.msra.mxu1 %v4438_v15 }
 0x12b   :  { %3039 = vmatprep.subr.bf16.mxu0 %v4445_v16  ;;  %3061 = vmatprep.subr.bf16.mxu1 %v4445_v16 }
 0x12e   :  { %3040 = vmatpush3.bf16.msra.mxu0 %v4452_v17  ;;  %3062 = vmatpush3.bf16.msra.mxu1 %v4452_v17 }
 0x12f   :  { %3041 = vmatprep.subr.bf16.mxu0 %v4459_v18  ;;  %3063 = vmatprep.subr.bf16.mxu1 %v4459_v18 }
 0x132   :  { %3042 = vmatpush3.bf16.msra.mxu0 %v4466_v19  ;;  %3064 = vmatpush3.bf16.msra.mxu1 %v4466_v19 }
 0x133   :  { %3071 = vmatprep.subr.bf16.mxu0 %v4357_v0  ;;  %3093 = vmatprep.subr.bf16.mxu1 %v4357_v0 }
 0x135   :  { %418 = vmatmul.mubr.bf16.vlgmr.msra.gmra.mrb[0].mxu0 %v2792_v22  ;;  %475 = vmatmul.mubr.bf16.vlgmr.msra.gmra.mrb[0].mxu1 %v2811_v23 }
 0x136   :  { %3072 = vmatpush3.bf16.msra.mxu0 %v4362_v1  ;;  %3094 = vmatpush3.bf16.msra.mxu1 %v4362_v1 }
 0x137   :  { %3073 = vmatprep.subr.bf16.mxu0 %v4369_v2  ;;  %3095 = vmatprep.subr.bf16.mxu1 %v4369_v2 }
 0x138   :  { %531 = vmatprep.mubr.bf16.mxu0 %v2815_v24  ;;  %588 = vmatprep.mubr.bf16.mxu1 %v2818_v25  ;;  %v3526_v25 = vld [vmem:[%s5002_s5 + $0x100] sm:$0xff]  }
 0x13a   :  { %3074 = vmatpush3.bf16.msra.mxu0 %v4376_v3  ;;  %3096 = vmatpush3.bf16.msra.mxu1 %v4376_v3 }
 0x13b   :  { %3075 = vmatprep.subr.bf16.mxu0 %v4383_v4  ;;  %3097 = vmatprep.subr.bf16.mxu1 %v4383_v4 }
 0x13e   :  { %3076 = vmatpush3.bf16.msra.mxu0 %v4390_v5  ;;  %3098 = vmatpush3.bf16.msra.mxu1 %v4390_v5 }
 0x13f   :  { %3077 = vmatprep.subr.bf16.mxu0 %v4397_v6  ;;  %3099 = vmatprep.subr.bf16.mxu1 %v4397_v6 }
 0x142   :  { %3078 = vmatpush3.bf16.msra.mxu0 %v4404_v7  ;;  %3100 = vmatpush3.bf16.msra.mxu1 %v4404_v7 }
 0x143   :  { %3079 = vmatprep.subr.bf16.mxu0 %v4411_v8  ;;  %3101 = vmatprep.subr.bf16.mxu1 %v4411_v8 }
 0x146   :  { %3080 = vmatpush3.bf16.msra.mxu0 %v4418_v9  ;;  %3102 = vmatpush3.bf16.msra.mxu1 %v4418_v9 }
 0x147   :  { %3081 = vmatprep.subr.bf16.mxu0 %v4425_v10  ;;  %3103 = vmatprep.subr.bf16.mxu1 %v4425_v10 }
 0x14a   :  { %3082 = vmatpush3.bf16.msra.mxu0 %v4438_v15  ;;  %3104 = vmatpush3.bf16.msra.mxu1 %v4438_v15 }
 0x14b   :  { %3083 = vmatprep.subr.bf16.mxu0 %v4445_v16  ;;  %3105 = vmatprep.subr.bf16.mxu1 %v4445_v16 }
 0x14e   :  { %3084 = vmatpush3.bf16.msra.mxu0 %v4452_v17  ;;  %3106 = vmatpush3.bf16.msra.mxu1 %v4452_v17 }
 0x14f   :  { %3085 = vmatprep.subr.bf16.mxu0 %v4459_v18  ;;  %3107 = vmatprep.subr.bf16.mxu1 %v4459_v18 }
 0x152   :  { %3086 = vmatpush3.bf16.msra.mxu0 %v4466_v19  ;;  %3108 = vmatpush3.bf16.msra.mxu1 %v4466_v19 }
 0x153   :  { %3115 = vmatprep.subr.bf16.mxu0 %v4357_v0  ;;  %3137 = vmatprep.subr.bf16.mxu1 %v4357_v0 }
 0x155   :  { %532 = vmatmul.mubr.bf16.vlgmr.msra.gmra.mrb[4].mxu0 %v2814_v28  ;;  %589 = vmatmul.mubr.bf16.vlgmr.msra.gmra.mrb[4].mxu1 %v2817_v29  ;;  %v3529_v28 = vld [vmem:[%s5002_s5 + $0x150] sm:$0xff]  }
 0x156   :  { %3116 = vmatpush3.bf16.msra.mxu0 %v4362_v1  ;;  %3138 = vmatpush3.bf16.msra.mxu1 %v4362_v1  ;;  %v3530_v29 = vld [vmem:[%s5002_s5 + $0x110] sm:$0xff]  }
 0x157   :  { %3117 = vmatprep.subr.bf16.mxu0 %v4369_v2  ;;  %3139 = vmatprep.subr.bf16.mxu1 %v4369_v2 }
 0x158   :  { %645 = vmatprep.mubr.bf16.mxu0 %v2821_v30  ;;  %702 = vmatprep.mubr.bf16.mxu1 %v2824_v31  ;;  %v3531_v30 = vld [vmem:[%s5002_s5 + $0x158] sm:$0xff]  }
 0x159   :  { %v3532_v31 = vld [vmem:[%s5002_s5 + $0x118] sm:$0xff]  }
 0x15a   :  { %3118 = vmatpush3.bf16.msra.mxu0 %v4376_v3  ;;  %3140 = vmatpush3.bf16.msra.mxu1 %v4376_v3 }
 0x15b   :  { %3119 = vmatprep.subr.bf16.mxu0 %v4383_v4  ;;  %3141 = vmatprep.subr.bf16.mxu1 %v4383_v4 }
 0x15e   :  { %3120 = vmatpush3.bf16.msra.mxu0 %v4390_v5  ;;  %3142 = vmatpush3.bf16.msra.mxu1 %v4390_v5 }
 0x15f   :  { %3121 = vmatprep.subr.bf16.mxu0 %v4397_v6  ;;  %3143 = vmatprep.subr.bf16.mxu1 %v4397_v6 }
 0x162   :  { %3122 = vmatpush3.bf16.msra.mxu0 %v4404_v7  ;;  %3144 = vmatpush3.bf16.msra.mxu1 %v4404_v7 }
 0x163   :  { %3123 = vmatprep.subr.bf16.mxu0 %v4411_v8  ;;  %3145 = vmatprep.subr.bf16.mxu1 %v4411_v8 }
 0x166   :  { %3124 = vmatpush3.bf16.msra.mxu0 %v4418_v9  ;;  %3146 = vmatpush3.bf16.msra.mxu1 %v4418_v9 }
 0x167   :  { %3125 = vmatprep.subr.bf16.mxu0 %v4425_v10  ;;  %3147 = vmatprep.subr.bf16.mxu1 %v4425_v10 }
 0x16a   :  { %3126 = vmatpush3.bf16.msra.mxu0 %v4438_v15  ;;  %3148 = vmatpush3.bf16.msra.mxu1 %v4438_v15 }
 0x16b   :  { %3127 = vmatprep.subr.bf16.mxu0 %v4445_v16  ;;  %3149 = vmatprep.subr.bf16.mxu1 %v4445_v16 }
 0x16e   :  { %3128 = vmatpush3.bf16.msra.mxu0 %v4452_v17  ;;  %3150 = vmatpush3.bf16.msra.mxu1 %v4452_v17 }
 0x16f   :  { %3129 = vmatprep.subr.bf16.mxu0 %v4459_v18  ;;  %3151 = vmatprep.subr.bf16.mxu1 %v4459_v18 }
 0x172   :  { %3130 = vmatpush3.bf16.msra.mxu0 %v4466_v19  ;;  %3152 = vmatpush3.bf16.msra.mxu1 %v4466_v19 }
 0x173   :  { %3159 = vmatprep.subr.bf16.mxu0 %v4357_v0  ;;  %3181 = vmatprep.subr.bf16.mxu1 %v3493_v33  ;;  %v3520_v0 = vld [vmem:[%s5002_s5 + $0xa8] sm:$0xff]   ;;  %v3534_v33 = vld [vmem:[%s5002_s5 + $0x120] sm:$0xff]  }
 0x175   :  { %646 = vmatmul.mubr.bf16.vlgmr.msra.gmra.mrb[8].mxu0 %v2820_v34  ;;  %703 = vmatmul.mubr.bf16.vlgmr.msra.gmra.mrb[8].mxu1 %v2823_v35  ;;  %v3535_v34 = vld [vmem:[%s5002_s5 + $0x168] sm:$0xff]  }
 0x176   :  { %3160 = vmatpush3.bf16.msra.mxu0 %v4362_v1  ;;  %759 = vmatprep.mubr.bf16.mxu0 %v2827_v37  ;;  %v3521_v1 = vld [vmem:[%s5002_s5 + $0xf0] sm:$0xff]   ;;  %v3536_v35 = vld [vmem:[%s5002_s5 + $0x128] sm:$0xff]  }
 0x177   :  { %3161 = vmatprep.subr.bf16.mxu0 %v4369_v2  ;;  %3182 = vmatpush3.bf16.msra.mxu1 %v3494_v36  ;;  %v3522_v2 = vld [vmem:[%s5002_s5 + $0xb0] sm:$0xff]  }
 0x178   :  { %3183 = vmatprep.subr.bf16.mxu1 %v3495_v38  ;;  %v3537_v36 = vld [vmem:[%s5002_s5 + $0x170] sm:$0xff]  }
 0x17a   :  { %3162 = vmatpush3.bf16.msra.mxu0 %v4376_v3  ;;  %v3523_v3 = vld [vmem:[%s5002_s5 + $0xf8] sm:$0xff]  }
 0x17b   :  { %3163 = vmatprep.subr.bf16.mxu0 %v4383_v4  ;;  %3184 = vmatpush3.bf16.msra.mxu1 %v3496_v39  ;;  %v3524_v4 = vld [vmem:[%s5002_s5 + $0xb8] sm:$0xff]   ;;  %v2813_v39 = vld [vmem:[#allocation2 + $0x2] ss:$0 sm:$0xff] }
 0x17c   :  { %3185 = vmatprep.subr.bf16.mxu1 %v3497_v40  ;;  %v3538_v40 = vld [vmem:[%s5002_s5 + $0x130] sm:$0xff]  }
 0x17e   :  { %3164 = vmatpush3.bf16.msra.mxu0 %v4390_v5  ;;  %v3525_v5 = vld [vmem:[%s5002_s5 + $0x140] sm:$0xff]  }
 0x17f   :  { %3165 = vmatprep.subr.bf16.mxu0 %v4397_v6  ;;  %3186 = vmatpush3.bf16.msra.mxu1 %v3498_v41  ;;  %v4042_v6 = vmov 0.0  }
 0x180   :  { %3187 = vmatprep.subr.bf16.mxu1 %v3499_v42  ;;  %v2816_v42 = vld [vmem:[#allocation2 + $0x3] ss:$0 sm:$0xff] }
 0x182   :  { %3166 = vmatpush3.bf16.msra.mxu0 %v4404_v7 }
 0x183   :  { %3167 = vmatprep.subr.bf16.mxu0 %v4411_v8  ;;  %3188 = vmatpush3.bf16.msra.mxu1 %v3500_v43 }
 0x184   :  { %3189 = vmatprep.subr.bf16.mxu1 %v3501_v44  ;;  %v3539_v44 = vld [vmem:[%s5002_s5 + $0x178] sm:$0xff]  }
 0x186   :  { %3168 = vmatpush3.bf16.msra.mxu0 %v4418_v9  ;;  %v2791_v9 = vld [vmem:[#allocation2] ss:$0 sm:$0xff] }
 0x187   :  { %3169 = vmatprep.subr.bf16.mxu0 %v4425_v10  ;;  %3190 = vmatpush3.bf16.msra.mxu1 %v3502_v45 }
 0x188   :  { %3191 = vmatprep.subr.bf16.mxu1 %v3503_v46 }
 0x18a   :  { %3170 = vmatpush3.bf16.msra.mxu0 %v4438_v15 }
 0x18b   :  { %3171 = vmatprep.subr.bf16.mxu0 %v4445_v16  ;;  %3192 = vmatpush3.bf16.msra.mxu1 %v3504_v47 }
 0x18c   :  { %3193 = vmatprep.subr.bf16.mxu1 %v3505_v48 }
 0x18e   :  { %3172 = vmatpush3.bf16.msra.mxu0 %v4452_v17 }
 0x18f   :  { %3173 = vmatprep.subr.bf16.mxu0 %v4459_v18  ;;  %3194 = vmatpush3.bf16.msra.mxu1 %v3506_v49 }
 0x190   :  { %3195 = vmatprep.subr.bf16.mxu1 %v3507_v50 }
 0x192   :  { %3174 = vmatpush3.bf16.msra.mxu0 %v4466_v19 }
 0x193   :  { %3196 = vmatpush3.bf16.msra.mxu1 %v3508_v51  ;;  %3203 = vmatprep.subr.bf16.mxu0 %v3509_v53  ;;  %v3540_v53 = vld [vmem:[%s5002_s5 + $0x138] sm:$0xff]  }
 0x194   :  { %3225 = vmatprep.subr.bf16.mxu1 %v3525_v5  ;;  %v2822_v5 = vld [vmem:[#allocation2 + $0x5] ss:$0 sm:$0xff] }
 0x195   :  { %760 = vmatmul.mubr.bf16.vlgmr.msra.gmra.mrb[12].mxu0 %v2826_v52 }
 0x196   :  { %3204 = vmatpush3.bf16.msra.mxu0 %v3510_v54 }
 0x197   :  { %3205 = vmatprep.subr.bf16.mxu0 %v3511_v55 }
 0x19a   :  { %3206 = vmatpush3.bf16.msra.mxu0 %v3512_v56 }
 0x19b   :  { %3207 = vmatprep.subr.bf16.mxu0 %v3513_v57 }
 0x19e   :  { %3208 = vmatpush3.bf16.msra.mxu0 %v3514_v58  ;;  %v3541_v58 = vld [vmem:[%s5002_s5 + $0x180] sm:$0xff]  }
 0x19f   :  { %3209 = vmatprep.subr.bf16.mxu0 %v3515_v59  ;;  %v3543_v59 = vld [vmem:[%s5002_s5 + $0x188] sm:$0xff]  }
 0x1a2   :  { %3210 = vmatpush3.bf16.msra.mxu0 %v3516_v60  ;;  %v3545_v60 = vld [vmem:[%s5002_s5 + $0x190] sm:$0xff]  }
 0x1a3   :  { %3211 = vmatprep.subr.bf16.mxu0 %v3517_v61  ;;  %v3547_v61 = vld [vmem:[%s5002_s5 + $0x198] sm:$0xff]  }
 0x1a6   :  { %3212 = vmatpush3.bf16.msra.mxu0 %v3518_v62  ;;  %v3549_v62 = vld [vmem:[%s5002_s5 + $0x1a0] sm:$0xff]  }
 0x1a7   :  { %3213 = vmatprep.subr.bf16.mxu0 %v3519_v63  ;;  %v3551_v63 = vld [vmem:[%s5002_s5 + $0x1a8] sm:$0xff]  }
 0x1aa   :  { %3214 = vmatpush3.bf16.msra.mxu0 %v3520_v0 }
 0x1ab   :  { %3215 = vmatprep.subr.bf16.mxu0 %v3521_v1 }
 0x1ae   :  { %3216 = vmatpush3.bf16.msra.mxu0 %v3522_v2  ;;  %v3553_v2 = vld [vmem:[%s5002_s5 + $0x1b0] sm:$0xff]  }
 0x1af   :  { %3217 = vmatprep.subr.bf16.mxu0 %v3523_v3  ;;  %v2819_v3 = vld [vmem:[#allocation2 + $0x4] ss:$0 sm:$0xff] }
 0x1b2   :  { %3218 = vmatpush3.bf16.msra.mxu0 %v3524_v4 }
 0x1b3   :  { %3323 = vmatprep.subr.bf16.mxu0 %v4042_v6 }
 0x208   :  { %v3043_v7 = vpop.f32.mrb[0].mxu0  ;;  %v3065_v8 = vpop.f32.mrb[0].mxu1 }
 0x209   :  { %v3044_v10 = vpop.f32.mrb[1].mxu0  ;;  %v3066_v12 = vpop.f32.mrb[1].mxu1 }
 0x20a   :  { %v3045_v13 = vadd.f32 %v3044_v10, %v3043_v7  ;;  %v3067_v14 = vadd.f32 %v3066_v12, %v3065_v8  ;;  %v3046_v15 = vpop.f32.mrb[2].mxu0  ;;  %v3068_v16 = vpop.f32.mrb[2].mxu1 }
 0x20b   :  { %v3047_v17 = vpop.f32.mrb[3].mxu0  ;;  %v3069_v18 = vpop.f32.mrb[3].mxu1  ;;  %v3555_v16 = vld [vmem:[%s5002_s5 + $0x1b8] sm:$0xff]  }
 0x20c   :  { %v420_v19 = vadd.f32 %v3045_v13, %v2791_v9  ;;  %v477_v20 = vadd.f32 %v3067_v14, %v2810_v11 }
 0x20e   :  { %v425_v21 = vmax.f32 %v420_v19, 0.0  ;;  %v482_v22 = vmax.f32 %v477_v20, 0.0 }
 0x210   :  { %v426_v23 = vpack.c.bf16 %v425_v21, %v425_v21  ;;  %v483_v24 = vpack.c.bf16 %v482_v22, %v482_v22  ;;  %v3542_v21 = vld [vmem:[#allocation4] sm:$0xff]   ;;  %v3544_v22 = vld [vmem:[#allocation4 + $0x8] sm:$0xff]  }
 0x212   :  { %1256 = vmatprep.mubr.bf16.mxu1 %v483_v24  ;;  %v3548_v24 = vld [vmem:[#allocation4 + $0x18] sm:$0xff]  }
 0x213   :  { %1257 = vmatmul.mubr.bf16.vlgmr.msra.gmra.mrb[12].mxu1 %v426_v23  ;;  %v3546_v23 = vld [vmem:[#allocation4 + $0x10] sm:$0xff]  }
 0x214   :  { %3226 = vmatpush3.bf16.msra.mxu1 %v3526_v25  ;;  %v3550_v25 = vld [vmem:[#allocation4 + $0x20] sm:$0xff]  }
 0x215   :  { %3227 = vmatprep.subr.bf16.mxu1 %v3527_v26  ;;  %v3552_v26 = vld [vmem:[#allocation4 + $0x28] sm:$0xff]  }
 0x218   :  { %3228 = vmatpush3.bf16.msra.mxu1 %v3528_v27 }
 0x219   :  { %3229 = vmatprep.subr.bf16.mxu1 %v3529_v28  ;;  %v3554_v28 = vld [vmem:[#allocation4 + $0x30] sm:$0xff]  }
 0x21c   :  { %3230 = vmatpush3.bf16.msra.mxu1 %v3530_v29  ;;  %v2825_v29 = vld [vmem:[#allocation2 + $0x6] ss:$0 sm:$0xff] }
 0x21d   :  { %3231 = vmatprep.subr.bf16.mxu1 %v3531_v30 }
 0x220   :  { %3232 = vmatpush3.bf16.msra.mxu1 %v3532_v31 }
 0x221   :  { %3233 = vmatprep.subr.bf16.mxu1 %v3533_v32 }
 0x224   :  { %3234 = vmatpush3.bf16.msra.mxu1 %v3534_v33 }
 0x225   :  { %3235 = vmatprep.subr.bf16.mxu1 %v3535_v34 }
 0x228   :  { %v3087_v37 = vpop.f32.mrb[4].mxu0  ;;  %v3109_v38 = vpop.f32.mrb[4].mxu1  ;;  %3236 = vmatpush3.bf16.msra.mxu1 %v3536_v35  ;;  %v3556_v35 = vld [vmem:[#allocation4 + $0x38] sm:$0xff]  }
 0x229   :  { %v3088_v41 = vpop.f32.mrb[5].mxu0  ;;  %v3110_v43 = vpop.f32.mrb[5].mxu1  ;;  %3237 = vmatprep.subr.bf16.mxu1 %v3537_v36 }
 0x22a   :  { %v3089_v45 = vadd.f32 %v3088_v41, %v3087_v37  ;;  %v3111_v46 = vadd.f32 %v3110_v43, %v3109_v38  ;;  %v3090_v47 = vpop.f32.mrb[6].mxu0  ;;  %v3112_v48 = vpop.f32.mrb[6].mxu1  ;;  %v1386_v38 = vld [vmem:[%s5003_s10] sm:$0xf]  ;;  %v3561_v43 = vld [vmem:[#allocation7 + $0x20] sm:$0xff]  }
 0x22b   :  { %v3091_v49 = vpop.f32.mrb[7].mxu0  ;;  %v3113_v50 = vpop.f32.mrb[7].mxu1  ;;  %v3559_v41 = vld [vmem:[#allocation7 + $0x10] sm:$0xff]   ;;  %v3565_v47 = vld [vmem:[#allocation10] sm:$0xff]  }
 0x22c   :  { %v534_v51 = vadd.f32 %v3089_v45, %v2813_v39  ;;  %v591_v52 = vadd.f32 %v3111_v46, %v2816_v42  ;;  %3238 = vmatpush3.bf16.msra.mxu1 %v3538_v40  ;;  %v3557_v39 = vld [vmem:[#allocation7] sm:$0xff]   ;;  %v3558_v40 = vld [vmem:[#allocation7 + $0x8] sm:$0xff]   ;;  %v3560_v42 = vld [vmem:[#allocation7 + $0x18] sm:$0xff]  }
 0x22d   :  { %3239 = vmatprep.subr.bf16.mxu1 %v3539_v44  ;;  %v3562_v44 = vld [vmem:[#allocation7 + $0x28] sm:$0xff]   ;;  %v3563_v45 = vld [vmem:[#allocation7 + $0x30] sm:$0xff]   ;;  %v3564_v46 = vld [vmem:[#allocation7 + $0x38] sm:$0xff]  }
 0x22e   :  { %v539_v54 = vmax.f32 %v534_v51, 0.0  ;;  %v596_v55 = vmax.f32 %v591_v52, 0.0  ;;  %v3566_v48 = vld [vmem:[#allocation10 + $0x8] sm:$0xff]   ;;  %v3567_v49 = vld [vmem:[#allocation10 + $0x10] sm:$0xff]   ;;  %v3568_v50 = vld [vmem:[#allocation10 + $0x18] sm:$0xff]  }
 0x22f   :  { %v3569_v51 = vld [vmem:[#allocation10 + $0x20] sm:$0xff]   ;;  %v3570_v52 = vld [vmem:[#allocation10 + $0x28] sm:$0xff]  }
 0x230   :  { %v540_v56 = vpack.c.bf16 %v539_v54, %v539_v54  ;;  %v597_v57 = vpack.c.bf16 %v596_v55, %v596_v55  ;;  %3240 = vmatpush3.bf16.msra.mxu1 %v3540_v53 }
 0x231   :  { %3343 = vmatprep.subr.bf16.mxu1 %v4042_v6 }
 0x232   :  { %1296 = vmatprep.mubr.bf16.mxu0 %v597_v57 }
 0x233   :  { %1297 = vmatmul.mubr.bf16.vlgmr.msra.gmra.mrb[16].mxu0 %v540_v56 }
 0x234   :  { %3324 = vmatpush3.bf16.msra.mxu0 %v3541_v58  ;;  %3339 = vmatprep.mubr.msk.bf16.mxu0 %vm4043_vm0, %v4042_v6  ;;  %v2828_v58 = vld [vmem:[%s5004_s25] ss:$0 sm:$0xff] }
 0x235   :  { %3325 = vmatprep.subr.bf16.mxu0 %v4042_v6 }
 0x238   :  { %3326 = vmatpush3.bf16.msra.mxu0 %v3543_v59 }
 0x239   :  { %3327 = vmatprep.subr.bf16.mxu0 %v4042_v6 }
 0x23c   :  { %3328 = vmatpush3.bf16.msra.mxu0 %v3545_v60 }
 0x23d   :  { %3329 = vmatprep.subr.bf16.mxu0 %v4042_v6 }
 0x240   :  { %3330 = vmatpush3.bf16.msra.mxu0 %v3547_v61 }
 0x241   :  { %3331 = vmatprep.subr.bf16.mxu0 %v4042_v6 }
 0x244   :  { %3332 = vmatpush3.bf16.msra.mxu0 %v3549_v62 }
 0x245   :  { %3333 = vmatprep.subr.bf16.mxu0 %v4042_v6 }
 0x248   :  { %v3131_v0 = vpop.f32.mrb[8].mxu0  ;;  %v3153_v1 = vpop.f32.mrb[8].mxu1  ;;  %3334 = vmatpush3.bf16.msra.mxu0 %v3551_v63 }
 0x249   :  { %v3132_v4 = vpop.f32.mrb[9].mxu0  ;;  %v3154_v7 = vpop.f32.mrb[9].mxu1  ;;  %3335 = vmatprep.subr.bf16.mxu0 %v4042_v6 }
 0x24a   :  { %v3133_v8 = vadd.f32 %v3132_v4, %v3131_v0  ;;  %v3155_v9 = vadd.f32 %v3154_v7, %v3153_v1  ;;  %v3134_v10 = vpop.f32.mrb[10].mxu0  ;;  %v3156_v11 = vpop.f32.mrb[10].mxu1 }
 0x24b   :  { %v3135_v12 = vpop.f32.mrb[11].mxu0  ;;  %v3157_v13 = vpop.f32.mrb[11].mxu1 }
 0x24c   :  { %v648_v14 = vadd.f32 %v3133_v8, %v2819_v3  ;;  %v705_v15 = vadd.f32 %v3155_v9, %v2822_v5  ;;  %3336 = vmatpush3.bf16.msra.mxu0 %v3553_v2  ;;  %v2885_v9 = vld [vmem:[#allocation6] ss:$0 sm:$0xff] }
 0x24d   :  { %3337 = vmatprep.subr.bf16.mxu0 %v4042_v6 }
 0x24e   :  { %v653_v17 = vmax.f32 %v648_v14, 0.0  ;;  %v710_v18 = vmax.f32 %v705_v15, 0.0 }
 0x250   :  { %v654_v19 = vpack.c.bf16 %v653_v17, %v653_v17  ;;  %v711_v20 = vpack.c.bf16 %v710_v18, %v710_v18  ;;  %3338 = vmatpush3.bf16.msra.mxu0 %v3555_v16 }
 0x251   :  { %3363 = vmatprep.subr.bf16.mxu0 %v4042_v6 }
 0x252   :  { %1336 = vmatprep.mubr.bf16.mxu1 %v711_v20 }
 0x253   :  { %1337 = vmatmul.mubr.bf16.vlgmr.msra.gmra.mrb[16].mxu1 %v654_v19 }
 0x254   :  { %3344 = vmatpush3.bf16.msra.mxu1 %v3542_v21  ;;  %3359 = vmatprep.mubr.msk.bf16.mxu1 %vm4043_vm0, %v4042_v6 }
 0x255   :  { %3345 = vmatprep.subr.bf16.mxu1 %v4042_v6 }
 0x258   :  { %3346 = vmatpush3.bf16.msra.mxu1 %v3544_v22  ;;  %v3571_v22 = vld [vmem:[#allocation10 + $0x30] sm:$0xff]  }
 0x259   :  { %3347 = vmatprep.subr.bf16.mxu1 %v4042_v6 }
 0x25c   :  { %3348 = vmatpush3.bf16.msra.mxu1 %v3546_v23  ;;  %v3572_v23 = vld [vmem:[#allocation10 + $0x38] sm:$0xff]  }
 0x25d   :  { %3349 = vmatprep.subr.bf16.mxu1 %v4042_v6 }
 0x260   :  { %3350 = vmatpush3.bf16.msra.mxu1 %v3548_v24  ;;  %v3573_v24 = vld [vmem:[%s4964_s12] sm:$0xff]  }
 0x261   :  { %3351 = vmatprep.subr.bf16.mxu1 %v4042_v6 }
 0x264   :  { %3352 = vmatpush3.bf16.msra.mxu1 %v3550_v25  ;;  %v3574_v25 = vld [vmem:[%s4964_s12 + $0x8] sm:$0xff]  }
 0x265   :  { %3353 = vmatprep.subr.bf16.mxu1 %v4042_v6 }
 0x268   :  { %3354 = vmatpush3.bf16.msra.mxu1 %v3552_v26  ;;  %v3175_v27 = vpop.f32.mrb[12].mxu0  ;;  %v3575_v26 = vld [vmem:[%s4964_s12 + $0x10] sm:$0xff]  }
 0x269   :  { %v3176_v30 = vpop.f32.mrb[13].mxu0  ;;  %3355 = vmatprep.subr.bf16.mxu1 %v4042_v6 }
 0x26a   :  { %v3177_v31 = vadd.f32 %v3176_v30, %v3175_v27  ;;  %v3178_v32 = vpop.f32.mrb[14].mxu0  ;;  %v3576_v27 = vld [vmem:[%s4964_s12 + $0x18] sm:$0xff]   ;;  %v2894_v30 = vld [vmem:[#allocation9] ss:$0 sm:$0xff] }
 0x26b   :  { %v3179_v33 = vpop.f32.mrb[15].mxu0 }
 0x26c   :  { %v762_v34 = vadd.f32 %v3177_v31, %v2825_v29  ;;  %3356 = vmatpush3.bf16.msra.mxu1 %v3554_v28  ;;  %v3577_v28 = vld [vmem:[%s4964_s12 + $0x20] sm:$0xff]   ;;  %v3578_v29 = vld [vmem:[%s4964_s12 + $0x28] sm:$0xff]  }
 0x26d   :  { %3357 = vmatprep.subr.bf16.mxu1 %v4042_v6 }
 0x26e   :  { %v767_v36 = vmax.f32 %v762_v34, 0.0 }
 0x270   :  { %v768_v37 = vpack.c.bf16 %v767_v36, %v767_v36  ;;  %3358 = vmatpush3.bf16.msra.mxu1 %v3556_v35 }
 0x271   :  { %3383 = vmatprep.subr.bf16.mxu1 %v4042_v6 }
 0x272   :  { %3340 = vmatmul.mubr.bf16.vlgmr.msra.gmra.mrb[20].mxu0 %v768_v37 }
 0x273   :  { %3360 = vmatmul.mubr.bf16.vlgmr.msra.gmra.mrb[20].mxu1 %v1386_v38  ;;  %3379 = vmatprep.mubr.msk.bf16.mxu0 %vm4043_vm0, %v4042_v6 }
 0x274   :  { %3399 = vmatprep.mubr.msk.bf16.mxu1 %vm4043_vm0, %v4042_v6  ;;  %3364 = vmatpush3.bf16.msra.mxu0 %v3557_v39 }
 0x275   :  { %3365 = vmatprep.subr.bf16.mxu0 %v4042_v6  ;;  %3384 = vmatpush3.bf16.msra.mxu1 %v3565_v47  ;;  %v3585_v47 = vld [vmem:[#allocation13 + $0x20] sm:$0xff]  }
 0x276   :  { %3385 = vmatprep.subr.bf16.mxu1 %v4042_v6 }
 0x278   :  { %3366 = vmatpush3.bf16.msra.mxu0 %v3558_v40 }
 0x279   :  { %3367 = vmatprep.subr.bf16.mxu0 %v4042_v6  ;;  %3386 = vmatpush3.bf16.msra.mxu1 %v3566_v48  ;;  %v3586_v48 = vld [vmem:[#allocation13 + $0x28] sm:$0xff]  }
 0x27a   :  { %3387 = vmatprep.subr.bf16.mxu1 %v4042_v6 }
 0x27c   :  { %3368 = vmatpush3.bf16.msra.mxu0 %v3559_v41  ;;  %v3579_v41 = vld [vmem:[%s4964_s12 + $0x30] sm:$0xff]  }
 0x27d   :  { %3369 = vmatprep.subr.bf16.mxu0 %v4042_v6  ;;  %3388 = vmatpush3.bf16.msra.mxu1 %v3567_v49  ;;  %v2903_v49 = vld [vmem:[#allocation12] ss:$0 sm:$0xff] }
 0x27e   :  { %3389 = vmatprep.subr.bf16.mxu1 %v4042_v6 }
 0x280   :  { %3370 = vmatpush3.bf16.msra.mxu0 %v3560_v42  ;;  %v3580_v42 = vld [vmem:[%s4964_s12 + $0x38] sm:$0xff]  }
 0x281   :  { %3371 = vmatprep.subr.bf16.mxu0 %v4042_v6  ;;  %3390 = vmatpush3.bf16.msra.mxu1 %v3568_v50 }
 0x282   :  { %3391 = vmatprep.subr.bf16.mxu1 %v4042_v6 }
 0x284   :  { %3372 = vmatpush3.bf16.msra.mxu0 %v3561_v43  ;;  %v3581_v43 = vld [vmem:[#allocation13] sm:$0xff]  }
 0x285   :  { %3373 = vmatprep.subr.bf16.mxu0 %v4042_v6  ;;  %3392 = vmatpush3.bf16.msra.mxu1 %v3569_v51 }
 0x286   :  { %3393 = vmatprep.subr.bf16.mxu1 %v4042_v6 }
 0x288   :  { %3374 = vmatpush3.bf16.msra.mxu0 %v3562_v44  ;;  %v3582_v44 = vld [vmem:[#allocation13 + $0x8] sm:$0xff]  }
 0x289   :  { %3375 = vmatprep.subr.bf16.mxu0 %v4042_v6  ;;  %3394 = vmatpush3.bf16.msra.mxu1 %v3570_v52 }
 0x28a   :  { %3395 = vmatprep.subr.bf16.mxu1 %v4042_v6 }
 0x28c   :  { %3376 = vmatpush3.bf16.msra.mxu0 %v3563_v45  ;;  %v3583_v45 = vld [vmem:[#allocation13 + $0x10] sm:$0xff]  }
 0x28d   :  { %3377 = vmatprep.subr.bf16.mxu0 %v4042_v6  ;;  %3396 = vmatpush3.bf16.msra.mxu1 %v3571_v22  ;;  %v3618_v22 = vld [vmem:[%s4970_s18 + $0x14] ss:$8 sps:$4 sm:$0xff]  }
 0x28e   :  { %3397 = vmatprep.subr.bf16.mxu1 %v4042_v6 }
 0x290   :  { %3378 = vmatpush3.bf16.msra.mxu0 %v3564_v46  ;;  %v3584_v46 = vld [vmem:[#allocation13 + $0x18] sm:$0xff]  }
 0x291   :  { %3403 = vmatprep.subr.bf16.mxu0 %v4042_v6  ;;  %3398 = vmatpush3.bf16.msra.mxu1 %v3572_v23  ;;  %v3616_v23 = vld [vmem:[%s4970_s18 + $0x10] ss:$8 sps:$4 sm:$0xff]  }
 0x292   :  { %3423 = vmatprep.subr.bf16.mxu1 %v4042_v6 }
 0x2e6   :  { %v3197_v53 = vpop.f32.mrb[12].mxu1 }
 0x2e7   :  { %v3198_v54 = vpop.f32.mrb[13].mxu1 }
 0x2e8   :  { %v3199_v55 = vadd.f32 %v3198_v54, %v3197_v53  ;;  %v3200_v56 = vpop.f32.mrb[14].mxu1 }
 0x2e9   :  { %v3201_v57 = vpop.f32.mrb[15].mxu1 }
 0x2ea   :  { %v1259_v61 = vadd.f32 %v3199_v55, %v2828_v58  ;;  %v3587_v57 = vld [vmem:[#allocation13 + $0x30] sm:$0xff]   ;;  %v3588_v58 = vld [vmem:[#allocation13 + $0x38] sm:$0xff]  }
 0x306   :  { %v3219_v59 = vpop.f32.mrb[16].mxu0 }
 0x307   :  { %v3220_v60 = vpop.f32.mrb[17].mxu0 }
 0x308   :  { %v3221_v62 = vadd.f32 %v3220_v60, %v3219_v59  ;;  %v3222_v63 = vpop.f32.mrb[18].mxu0  ;;  %v3589_v59 = vld [vmem:[#allocation15] ss:$8 sps:$4 sm:$0xff]   ;;  %v3591_v60 = vld [vmem:[#allocation15 + $0x4] ss:$8 sps:$4 sm:$0xff]  }
 0x309   :  { %v3223_v0 = vpop.f32.mrb[19].mxu0  ;;  %v3597_v63 = vld [vmem:[#allocation15 + $0x24] ss:$8 sps:$4 sm:$0xff]  }
 0x30a   :  { %v1299_v1 = vadd.f32 %v3221_v62, %v1259_v61  ;;  %v3594_v61 = vld [vmem:[#allocation15 + $0x14] ss:$8 sps:$4 sm:$0xff]   ;;  %v3592_v62 = vld [vmem:[#allocation15 + $0x10] ss:$8 sps:$4 sm:$0xff]   ;;  %v3595_v0 = vld [vmem:[#allocation15 + $0x20] ss:$8 sps:$4 sm:$0xff]  }
 0x326   :  { %v3241_v2 = vpop.f32.mrb[16].mxu1 }
 0x327   :  { %v3242_v3 = vpop.f32.mrb[17].mxu1 }
 0x328   :  { %v3243_v4 = vadd.f32 %v3242_v3, %v3241_v2  ;;  %v3244_v5 = vpop.f32.mrb[18].mxu1  ;;  %v3598_v2 = vld [vmem:[#allocation15 + $0x30] ss:$8 sps:$4 sm:$0xff]   ;;  %v3603_v3 = vld [vmem:[#allocation15 + $0x44] ss:$8 sps:$4 sm:$0xff]  }
 0x329   :  { %v3245_v7 = vpop.f32.mrb[19].mxu1  ;;  %v3604_v5 = vld [vmem:[#allocation15 + $0x50] ss:$8 sps:$4 sm:$0xff]  }
 0x32a   :  { %v1339_v8 = vadd.f32 %v3243_v4, %v1299_v1  ;;  %v3600_v1 = vld [vmem:[#allocation15 + $0x34] ss:$8 sps:$4 sm:$0xff]   ;;  %v3609_v7 = vld [vmem:[#allocation15 + $0x64] ss:$8 sps:$4 sm:$0xff]  }
 0x32b   :  { %v3606_v4 = vld [vmem:[#allocation15 + $0x54] ss:$8 sps:$4 sm:$0xff]  }
 0x345   :  { %v1378_v10 = vpop.f32.mrb[20].mxu0 }
 0x346   :  { %v1379_v11 = vadd.f32 %v1378_v10, %v1339_v8  ;;  %v1492_v12 = vpop.f32.mrb[20].mxu1  ;;  %v3341_v13 = vpop.f32.mrb[21].mxu0  ;;  %v3607_v8 = vld [vmem:[#allocation15 + $0x60] ss:$8 sps:$4 sm:$0xff]  }
 0x347   :  { %v1493_v14 = vadd.f32 %v2885_v9, %v1492_v12  ;;  %v3361_v15 = vpop.f32.mrb[21].mxu1  ;;  %v1381_v16 = vpop.f32.mrb[22].mxu0  ;;  %v2912_v9 = vld [vmem:[%s4965_s13] ss:$0 sm:$0xff] }
 0x348   :  { %v1495_v17 = vpop.f32.mrb[22].mxu1  ;;  %v3342_v18 = vpop.f32.mrb[23].mxu0  ;;  %v1384_v32 = vmax.f32 %v1379_v11, 0.0 }
 0x349   :  { %v1498_v19 = vmax.f32 %v1493_v14, 0.0  ;;  %v3362_v20 = vpop.f32.mrb[23].mxu1  ;;  %v3612_v17 = vld [vmem:[#allocation15 + $0x74] ss:$8 sps:$4 sm:$0xff]   ;;  %v3610_v18 = vld [vmem:[#allocation15 + $0x70] ss:$8 sps:$4 sm:$0xff]  }
 0x34a   :  { %v1385_v38 = vpack.c.bf16 %v1384_v32, %v1384_v32  ;;  %v3613_v20 = vld [vmem:[%s4970_s18] ss:$8 sps:$4 sm:$0xff]   ;;  %v3633_v32 = vld [vmem:[%s4970_s18 + $0x64] ss:$8 sps:$4 sm:$0xff]  }
 0x34b   :  { %v1499_v21 = vpack.c.bf16 %v1498_v19, %v1498_v19  ;;  %v4044_v19 = vmov 0  }
 0x34d   :  { %3380 = vmatmul.mubr.bf16.vlgmr.msra.gmra.mrb[24].mxu0 %v1499_v21  ;;  %v3615_v21 = vld [vmem:[%s4970_s18 + $0x4] ss:$8 sps:$4 sm:$0xff]  }
 0x34e   :  { %3419 = vmatprep.mubr.msk.bf16.mxu0 %vm4043_vm0, %v4042_v6  ;;  %3404 = vmatpush3.bf16.msra.mxu0 %v3573_v24  ;;  %v3621_v24 = vld [vmem:[%s4970_s18 + $0x24] ss:$8 sps:$4 sm:$0xff]  }
 0x34f   :  { %3405 = vmatprep.subr.bf16.mxu0 %v4042_v6 }
 0x352   :  { %3406 = vmatpush3.bf16.msra.mxu0 %v3574_v25  ;;  %v3619_v25 = vld [vmem:[%s4970_s18 + $0x20] ss:$8 sps:$4 sm:$0xff]  }
 0x353   :  { %3407 = vmatprep.subr.bf16.mxu0 %v4042_v6 }
 0x356   :  { %3408 = vmatpush3.bf16.msra.mxu0 %v3575_v26  ;;  %v3624_v26 = vld [vmem:[%s4970_s18 + $0x34] ss:$8 sps:$4 sm:$0xff]  }
 0x357   :  { %3409 = vmatprep.subr.bf16.mxu0 %v4042_v6 }
 0x35a   :  { %3410 = vmatpush3.bf16.msra.mxu0 %v3576_v27  ;;  %v3622_v27 = vld [vmem:[%s4970_s18 + $0x30] ss:$8 sps:$4 sm:$0xff]  }
 0x35b   :  { %3411 = vmatprep.subr.bf16.mxu0 %v4042_v6 }
 0x35e   :  { %3412 = vmatpush3.bf16.msra.mxu0 %v3577_v28  ;;  %v3627_v28 = vld [vmem:[%s4970_s18 + $0x44] ss:$8 sps:$4 sm:$0xff]  }
 0x35f   :  { %3413 = vmatprep.subr.bf16.mxu0 %v4042_v6 }
 0x362   :  { %3414 = vmatpush3.bf16.msra.mxu0 %v3578_v29  ;;  %v3625_v29 = vld [vmem:[%s4970_s18 + $0x40] ss:$8 sps:$4 sm:$0xff]  }
 0x363   :  { %3415 = vmatprep.subr.bf16.mxu0 %v4042_v6 }
 0x366   :  { %3416 = vmatpush3.bf16.msra.mxu0 %v3579_v41  ;;  %v3643_v41 = vld [vmem:[%s4970_s18 + $0xa0] ss:$8 sps:$4 sm:$0xff]  }
 0x367   :  { %3417 = vmatprep.subr.bf16.mxu0 %v4042_v6 }
 0x36a   :  { %3418 = vmatpush3.bf16.msra.mxu0 %v3580_v42  ;;  %v3648_v42 = vld [vmem:[%s4970_s18 + $0xb4] ss:$8 sps:$4 sm:$0xff]  }
 0x36b   :  { %2061 = vmatprep.subr.bf16.mxu0 %v3591_v60  ;;  %v3661_v60 = vld [vmem:[#allocation16] ss:$8 sps:$4 sm:$0xff]  }
 0x420   :  { %v1605_v31 = vpop.f32.mrb[24].mxu0 }
 0x421   :  { %v1606_v33 = vadd.f32 %v2894_v30, %v1605_v31  ;;  %v3381_v34 = vpop.f32.mrb[25].mxu0  ;;  %v3630_v30 = vld [vmem:[%s4970_s18 + $0x54] ss:$8 sps:$4 sm:$0xff]   ;;  %v3628_v31 = vld [vmem:[%s4970_s18 + $0x50] ss:$8 sps:$4 sm:$0xff]  }
 0x422   :  { %v1608_v35 = vpop.f32.mrb[26].mxu0  ;;  %v3636_v34 = vld [vmem:[%s4970_s18 + $0x74] ss:$8 sps:$4 sm:$0xff]  }
 0x423   :  { %v1611_v36 = vmax.f32 %v1606_v33, 0.0  ;;  %v3382_v37 = vpop.f32.mrb[27].mxu0  ;;  %v3631_v33 = vld [vmem:[%s4970_s18 + $0x60] ss:$8 sps:$4 sm:$0xff]   ;;  %v3634_v35 = vld [vmem:[%s4970_s18 + $0x70] ss:$8 sps:$4 sm:$0xff]  }
 0x424   :  { %v3637_v37 = vld [vmem:[%s4970_s18 + $0x80] ss:$8 sps:$4 sm:$0xff]  }
 0x425   :  { %v1612_v39 = vpack.c.bf16 %v1611_v36, %v1611_v36  ;;  %v3639_v36 = vld [vmem:[%s4970_s18 + $0x84] ss:$8 sps:$4 sm:$0xff]  }
 0x427   :  { %v1613_v40 = vadd.bf16 %v1612_v39, %v1385_v38  ;;  %v3642_v38 = vld [vmem:[%s4970_s18 + $0x94] ss:$8 sps:$4 sm:$0xff]   ;;  %v3640_v39 = vld [vmem:[%s4970_s18 + $0x90] ss:$8 sps:$4 sm:$0xff]  }
 0x429   :  { %3400 = vmatmul.mubr.bf16.vlgmr.msra.gmra.mrb[24].mxu1 %v1613_v40  ;;  %v3645_v40 = vld [vmem:[%s4970_s18 + $0xa4] ss:$8 sps:$4 sm:$0xff]  }
 0x42a   :  { %3439 = vmatprep.mubr.msk.bf16.mxu1 %vm4043_vm0, %v4042_v6  ;;  %3424 = vmatpush3.bf16.msra.mxu1 %v3581_v43  ;;  %v3646_v43 = vld [vmem:[%s4970_s18 + $0xb0] ss:$8 sps:$4 sm:$0xff]  }
 0x42b   :  { %3425 = vmatprep.subr.bf16.mxu1 %v4042_v6 }
 0x42e   :  { %3426 = vmatpush3.bf16.msra.mxu1 %v3582_v44  ;;  %v3651_v44 = vld [vmem:[%s4970_s18 + $0xc4] ss:$8 sps:$4 sm:$0xff]  }
 0x42f   :  { %3427 = vmatprep.subr.bf16.mxu1 %v4042_v6 }
 0x432   :  { %3428 = vmatpush3.bf16.msra.mxu1 %v3583_v45  ;;  %v3649_v45 = vld [vmem:[%s4970_s18 + $0xc0] ss:$8 sps:$4 sm:$0xff]  }
 0x433   :  { %3429 = vmatprep.subr.bf16.mxu1 %v4042_v6 }
 0x436   :  { %3430 = vmatpush3.bf16.msra.mxu1 %v3584_v46  ;;  %v3654_v46 = vld [vmem:[%s4970_s18 + $0xd4] ss:$8 sps:$4 sm:$0xff]  }
 0x437   :  { %3431 = vmatprep.subr.bf16.mxu1 %v4042_v6 }
 0x43a   :  { %3432 = vmatpush3.bf16.msra.mxu1 %v3585_v47  ;;  %v3652_v47 = vld [vmem:[%s4970_s18 + $0xd0] ss:$8 sps:$4 sm:$0xff]  }
 0x43b   :  { %3433 = vmatprep.subr.bf16.mxu1 %v4042_v6 }
 0x43e   :  { %3434 = vmatpush3.bf16.msra.mxu1 %v3586_v48  ;;  %v2921_v48 = vld [vmem:[%s4967_s15] ss:$0 sm:$0xff] }
 0x43f   :  { %3435 = vmatprep.subr.bf16.mxu1 %v4042_v6 }
 0x442   :  { %3436 = vmatpush3.bf16.msra.mxu1 %v3587_v57  ;;  %v3655_v57 = vld [vmem:[%s4970_s18 + $0xe0] ss:$8 sps:$4 sm:$0xff]  }
 0x443   :  { %3437 = vmatprep.subr.bf16.mxu1 %v4042_v6  ;;  %v3601_v6 = vld [vmem:[#allocation15 + $0x40] ss:$8 sps:$4 sm:$0xff]  }
 0x446   :  { %3438 = vmatpush3.bf16.msra.mxu1 %v3588_v58  ;;  %v3660_v58 = vld [vmem:[%s4970_s18 + $0xf4] ss:$8 sps:$4 sm:$0xff]  }
 0x447   :  { %2310 = vmatprep.subr.bf16.mxu1 %v3615_v21  ;;  %v3697_v21 = vld [vmem:[#allocation16 + $0xc0] ss:$8 sps:$4 sm:$0xff]  }
 0x4fc   :  { %v1719_v50 = vpop.f32.mrb[24].mxu1 }
 0x4fd   :  { %v1720_v51 = vadd.f32 %v2903_v49, %v1719_v50  ;;  %v3401_v52 = vpop.f32.mrb[25].mxu1 }
 0x4fe   :  { %v1722_v53 = vpop.f32.mrb[26].mxu1 }
 0x4ff   :  { %v1725_v54 = vmax.f32 %v1720_v51, 0.0  ;;  %v3402_v55 = vpop.f32.mrb[27].mxu1 }
 0x501   :  { %v1726_v56 = vpack.c.bf16 %v1725_v54, %v1725_v54 }
 0x503   :  { %3420 = vmatmul.mubr.bf16.vlgmr.msra.gmra.mrb[28].mxu0 %v1726_v56  ;;  %v3657_v56 = vld [vmem:[%s4970_s18 + $0xe4] ss:$8 sps:$4 sm:$0xff]  }
 0x504   :  { %2062 = vmatpush1.bf16.msra.mxu0 %v3589_v59  ;;  %2093 = vmatprep.mubr.bf16.mxu0 %v4044_v19  ;;  %v3658_v59 = vld [vmem:[%s4970_s18 + $0xf0] ss:$8 sps:$4 sm:$0xff]   ;;  %v3694_v19 = vld [vmem:[#allocation16 + $0xb0] ss:$8 sps:$4 sm:$0xff]  }
 0x505   :  { %2063 = vmatprep.subr.bf16.mxu0 %v3594_v61  ;;  %v3663_v61 = vld [vmem:[#allocation16 + $0x4] ss:$8 sps:$4 sm:$0xff]  }
 0x508   :  { %2064 = vmatpush1.bf16.msra.mxu0 %v3592_v62  ;;  %v3666_v62 = vld [vmem:[#allocation16 + $0x14] ss:$8 sps:$4 sm:$0xff]  }
 0x509   :  { %2065 = vmatprep.subr.bf16.mxu0 %v3597_v63  ;;  %v3664_v63 = vld [vmem:[#allocation16 + $0x10] ss:$8 sps:$4 sm:$0xff]  }
 0x50c   :  { %2066 = vmatpush1.bf16.msra.mxu0 %v3595_v0  ;;  %v3669_v0 = vld [vmem:[#allocation16 + $0x24] ss:$8 sps:$4 sm:$0xff]  }
 0x50d   :  { %2067 = vmatprep.subr.bf16.mxu0 %v3600_v1  ;;  %v3667_v1 = vld [vmem:[#allocation16 + $0x20] ss:$8 sps:$4 sm:$0xff]  }
 0x510   :  { %2068 = vmatpush1.bf16.msra.mxu0 %v3598_v2  ;;  %v3672_v2 = vld [vmem:[#allocation16 + $0x34] ss:$8 sps:$4 sm:$0xff]  }
 0x511   :  { %2069 = vmatprep.subr.bf16.mxu0 %v3603_v3  ;;  %v3670_v3 = vld [vmem:[#allocation16 + $0x30] ss:$8 sps:$4 sm:$0xff]  }
 0x514   :  { %2070 = vmatpush1.bf16.msra.mxu0 %v3601_v6  ;;  %v3675_v6 = vld [vmem:[#allocation16 + $0x44] ss:$8 sps:$4 sm:$0xff]  }
 0x515   :  { %2071 = vmatprep.subr.bf16.mxu0 %v3606_v4  ;;  %v3673_v4 = vld [vmem:[#allocation16 + $0x40] ss:$8 sps:$4 sm:$0xff]  }
 0x518   :  { %2072 = vmatpush1.bf16.msra.mxu0 %v3604_v5  ;;  %v3678_v5 = vld [vmem:[#allocation16 + $0x54] ss:$8 sps:$4 sm:$0xff]  }
 0x519   :  { %2073 = vmatprep.subr.bf16.mxu0 %v3609_v7  ;;  %v3676_v7 = vld [vmem:[#allocation16 + $0x50] ss:$8 sps:$4 sm:$0xff]  }
 0x51c   :  { %2074 = vmatpush1.bf16.msra.mxu0 %v3607_v8  ;;  %v3681_v8 = vld [vmem:[#allocation16 + $0x64] ss:$8 sps:$4 sm:$0xff]  }
 0x51d   :  { %2075 = vmatprep.subr.bf16.mxu0 %v3612_v17  ;;  %v3691_v17 = vld [vmem:[#allocation16 + $0xa0] ss:$8 sps:$4 sm:$0xff]  }
 0x520   :  { %2076 = vmatpush1.bf16.msra.mxu0 %v3610_v18  ;;  %v3696_v18 = vld [vmem:[#allocation16 + $0xb4] ss:$8 sps:$4 sm:$0xff]  }
 0x521   :  { %2559 = vmatprep.subr.bf16.mxu0 %v3663_v61 }
 0x5d6   :  { %v1832_v10 = vpop.f32.mrb[28].mxu0 }
 0x5d7   :  { %v1833_v11 = vadd.f32 %v2912_v9, %v1832_v10  ;;  %v3421_v12 = vpop.f32.mrb[29].mxu0  ;;  %v3679_v9 = vld [vmem:[#allocation16 + $0x60] ss:$8 sps:$4 sm:$0xff]   ;;  %v3684_v10 = vld [vmem:[#allocation16 + $0x74] ss:$8 sps:$4 sm:$0xff]  }
 0x5d8   :  { %v1835_v13 = vpop.f32.mrb[30].mxu0  ;;  %v3687_v12 = vld [vmem:[#allocation16 + $0x84] ss:$8 sps:$4 sm:$0xff]  }
 0x5d9   :  { %v1838_v14 = vmax.f32 %v1833_v11, 0.0  ;;  %v3422_v15 = vpop.f32.mrb[31].mxu0  ;;  %v3682_v11 = vld [vmem:[#allocation16 + $0x70] ss:$8 sps:$4 sm:$0xff]   ;;  %v3685_v13 = vld [vmem:[#allocation16 + $0x80] ss:$8 sps:$4 sm:$0xff]  }
 0x5da   :  { %v3688_v15 = vld [vmem:[#allocation16 + $0x90] ss:$8 sps:$4 sm:$0xff]  }
 0x5db   :  { %v1839_v16 = vpack.c.bf16 %v1838_v14, %v1838_v14  ;;  %v3690_v14 = vld [vmem:[#allocation16 + $0x94] ss:$8 sps:$4 sm:$0xff]  }
 0x5dd   :  { %3440 = vmatmul.mubr.bf16.vlgmr.msra.gmra.mrb[28].mxu1 %v1839_v16  ;;  %v3693_v16 = vld [vmem:[#allocation16 + $0xa4] ss:$8 sps:$4 sm:$0xff]  }
 0x5de   :  { %2311 = vmatpush1.bf16.msra.mxu1 %v3613_v20  ;;  %v3699_v20 = vld [vmem:[#allocation16 + $0xc4] ss:$8 sps:$4 sm:$0xff]  }
 0x5df   :  { %2312 = vmatprep.subr.bf16.mxu1 %v3618_v22  ;;  %v3702_v22 = vld [vmem:[#allocation16 + $0xd4] ss:$8 sps:$4 sm:$0xff]  }
 0x5e2   :  { %2313 = vmatpush1.bf16.msra.mxu1 %v3616_v23  ;;  %v3700_v23 = vld [vmem:[#allocation16 + $0xd0] ss:$8 sps:$4 sm:$0xff]  }
 0x5e3   :  { %2314 = vmatprep.subr.bf16.mxu1 %v3621_v24  ;;  %v1971_v24 = vlaneseq }
 0x5e6   :  { %2315 = vmatpush1.bf16.msra.mxu1 %v3619_v25  ;;  %v1972_v25 = vshrl.u32 %v1971_v24, 7  ;;  %v3010_v24 = vld [vmem:[#allocation21] ss:$0 sm:$0xff] }
 0x5e7   :  { %2316 = vmatprep.subr.bf16.mxu1 %v3624_v26 }
 0x5e8   :  { %v4933_v26 = vsub.s32 0, %v1972_v25 }
 0x5ea   :  { %2317 = vmatpush1.bf16.msra.mxu1 %v3622_v27  ;;  %v1969_v27 = vld [vmem:[%s5005_s0] sm:$0x3] }
 0x5eb   :  { %2318 = vmatprep.subr.bf16.mxu1 %v3627_v28  ;;  %v4938_v28 = vsub.s32 1, %v1972_v25 }
 0x5ee   :  { %2319 = vmatpush1.bf16.msra.mxu1 %v3625_v29  ;;  %v1974_v29 = vrot.slane %v1969_v27, %v4933_v26 }
 0x5ef   :  { %2320 = vmatprep.subr.bf16.mxu1 %v3630_v30  ;;  %v1978_v30 = vrot.slane %v1969_v27, %v4938_v28 }
 0x5f2   :  { %2321 = vmatpush1.bf16.msra.mxu1 %v3628_v31 }
 0x5f3   :  { %2322 = vmatprep.subr.bf16.mxu1 %v3633_v32 }
 0x5f6   :  { %2323 = vmatpush1.bf16.msra.mxu1 %v3631_v33 }
 0x5f7   :  { %2324 = vmatprep.subr.bf16.mxu1 %v3636_v34 }
 0x5fa   :  { %2325 = vmatpush1.bf16.msra.mxu1 %v3634_v35 }
 0x5fb   :  { %2326 = vmatprep.subr.bf16.mxu1 %v3639_v36 }
 0x5fe   :  { %2327 = vmatpush1.bf16.msra.mxu1 %v3637_v37 }
 0x5ff   :  { %2328 = vmatprep.subr.bf16.mxu1 %v3642_v38 }
 0x602   :  { %2329 = vmatpush1.bf16.msra.mxu1 %v3640_v39 }
 0x603   :  { %2330 = vmatprep.subr.bf16.mxu1 %v3645_v40 }
 0x606   :  { %2331 = vmatpush1.bf16.msra.mxu1 %v3643_v41  ;;  %v3705_v41 = vld [vmem:[#allocation16 + $0xe4] ss:$8 sps:$4 sm:$0xff]  }
 0x607   :  { %2332 = vmatprep.subr.bf16.mxu1 %v3648_v42  ;;  %v3703_v42 = vld [vmem:[#allocation16 + $0xe0] ss:$8 sps:$4 sm:$0xff]  }
 0x60a   :  { %2333 = vmatpush1.bf16.msra.mxu1 %v3646_v43  ;;  %v3708_v43 = vld [vmem:[#allocation16 + $0xf4] ss:$8 sps:$4 sm:$0xff]  }
 0x60b   :  { %2334 = vmatprep.subr.bf16.mxu1 %v3651_v44  ;;  %v3706_v44 = vld [vmem:[#allocation16 + $0xf0] ss:$8 sps:$4 sm:$0xff]  }
 0x60e   :  { %2335 = vmatpush1.bf16.msra.mxu1 %v3649_v45  ;;  %v3709_v45 = vld [vmem:[#allocation19 + $0x40] sm:$0xff]  }
 0x60f   :  { %2336 = vmatprep.subr.bf16.mxu1 %v3654_v46  ;;  %v3710_v46 = vld [vmem:[#allocation19] sm:$0xff]  }
 0x612   :  { %2337 = vmatpush1.bf16.msra.mxu1 %v3652_v47  ;;  %v3711_v47 = vld [vmem:[#allocation19 + $0x48] sm:$0xff]  }
 0x613   :  { %2338 = vmatprep.subr.bf16.mxu1 %v3657_v56  ;;  %v3720_v56 = vld [vmem:[#allocation19 + $0x28] sm:$0xff]  }
 0x616   :  { %2339 = vmatpush1.bf16.msra.mxu1 %v3655_v57  ;;  %v2138_v57 = vld [vmem:[%s5006_s8] sm:$0x3] }
 0x617   :  { %2340 = vmatprep.subr.bf16.mxu1 %v3660_v58  ;;  %v2143_v58 = vrot.slane %v2138_v57, %v4933_v26 }
 0x61a   :  { %2341 = vmatpush1.bf16.msra.mxu1 %v3658_v59  ;;  %v2147_v59 = vrot.slane %v2138_v57, %v4938_v28 }
 0x61b   :  { %3301 = vmatprep.subr.bf16.mxu1 %v3709_v45 }
 0x6b0   :  { %v1945_v49 = vpop.f32.mrb[28].mxu1 }
 0x6b1   :  { %v1946_v50 = vadd.f32 %v2921_v48, %v1945_v49  ;;  %v3441_v51 = vpop.f32.mrb[29].mxu1  ;;  %v3712_v48 = vld [vmem:[#allocation19 + $0x8] sm:$0xff]   ;;  %v3713_v49 = vld [vmem:[#allocation19 + $0x50] sm:$0xff]  }
 0x6b2   :  { %v1948_v52 = vpop.f32.mrb[30].mxu1  ;;  %v3715_v51 = vld [vmem:[#allocation19 + $0x58] sm:$0xff]  }
 0x6b3   :  { %v1951_v53 = vmax.f32 %v1946_v50, 0.0  ;;  %v3442_v54 = vpop.f32.mrb[31].mxu1  ;;  %v3714_v50 = vld [vmem:[#allocation19 + $0x10] sm:$0xff]   ;;  %v3716_v52 = vld [vmem:[#allocation19 + $0x18] sm:$0xff]  }
 0x6b4   :  { %v3718_v54 = vld [vmem:[#allocation19 + $0x20] sm:$0xff]  }
 0x6b5   :  { %v1952_v55 = vpack.c.bf16 %v1951_v53, %v1951_v53  ;;  %v3717_v53 = vld [vmem:[#allocation19 + $0x60] sm:$0xff]  }
 0x6b7   :  { %2094 = vmatmul.mubr.bf16.vlgmr.msra.gmra.mrb[32].mxu0 %v1952_v55  ;;  %v3719_v55 = vld [vmem:[#allocation19 + $0x68] sm:$0xff]  }
 0x6b8   :  { %2560 = vmatpush1.bf16.msra.mxu0 %v3661_v60 }
 0x6b9   :  { %2561 = vmatprep.subr.bf16.mxu0 %v3666_v62 }
 0x6bc   :  { %2562 = vmatpush1.bf16.msra.mxu0 %v3664_v63 }
 0x6bd   :  { %2563 = vmatprep.subr.bf16.mxu0 %v3669_v0 }
 0x6c0   :  { %2564 = vmatpush1.bf16.msra.mxu0 %v3667_v1 }
 0x6c1   :  { %2565 = vmatprep.subr.bf16.mxu0 %v3672_v2 }
 0x6c4   :  { %2566 = vmatpush1.bf16.msra.mxu0 %v3670_v3 }
 0x6c5   :  { %2567 = vmatprep.subr.bf16.mxu0 %v3675_v6 }
 0x6c8   :  { %2568 = vmatpush1.bf16.msra.mxu0 %v3673_v4 }
 0x6c9   :  { %2569 = vmatprep.subr.bf16.mxu0 %v3678_v5  ;;  %v3721_v5 = vld [vmem:[#allocation19 + $0x70] sm:$0xff]  }
 0x6cc   :  { %2570 = vmatpush1.bf16.msra.mxu0 %v3676_v7  ;;  %v3722_v7 = vld [vmem:[#allocation19 + $0x30] sm:$0xff]  }
 0x6cd   :  { %2571 = vmatprep.subr.bf16.mxu0 %v3681_v8  ;;  %v3723_v8 = vld [vmem:[#allocation19 + $0x78] sm:$0xff]  }
 0x6d0   :  { %2572 = vmatpush1.bf16.msra.mxu0 %v3679_v9  ;;  %v3724_v9 = vld [vmem:[#allocation19 + $0x38] sm:$0xff]  }
 0x6d1   :  { %2573 = vmatprep.subr.bf16.mxu0 %v3684_v10  ;;  %v2387_v10 = vld [vmem:[#allocation18] sm:$0x3] }
 0x6d4   :  { %2574 = vmatpush1.bf16.msra.mxu0 %v3682_v11  ;;  %v2392_v11 = vrot.slane %v2387_v10, %v4933_v26 }
 0x6d5   :  { %2575 = vmatprep.subr.bf16.mxu0 %v3687_v12  ;;  %v2396_v12 = vrot.slane %v2387_v10, %v4938_v28 }
 0x6d8   :  { %2576 = vmatpush1.bf16.msra.mxu0 %v3685_v13 }
 0x6d9   :  { %2577 = vmatprep.subr.bf16.mxu0 %v3690_v14 }
 0x6dc   :  { %2578 = vmatpush1.bf16.msra.mxu0 %v3688_v15 }
 0x6dd   :  { %2579 = vmatprep.subr.bf16.mxu0 %v3693_v16 }
 0x6e0   :  { %2580 = vmatpush1.bf16.msra.mxu0 %v3691_v17 }
 0x6e1   :  { %2581 = vmatprep.subr.bf16.mxu0 %v3696_v18 }
 0x6e4   :  { %2582 = vmatpush1.bf16.msra.mxu0 %v3694_v19 }
 0x6e5   :  { %2583 = vmatprep.subr.bf16.mxu0 %v3699_v20 }
 0x6e8   :  { %2584 = vmatpush1.bf16.msra.mxu0 %v3697_v21 }
 0x6e9   :  { %2585 = vmatprep.subr.bf16.mxu0 %v3702_v22 }
 0x6ec   :  { %2586 = vmatpush1.bf16.msra.mxu0 %v3700_v23 }
 0x6ed   :  { %2587 = vmatprep.subr.bf16.mxu0 %v3705_v41 }
 0x6f0   :  { %2588 = vmatpush1.bf16.msra.mxu0 %v3703_v42 }
 0x6f1   :  { %2589 = vmatprep.subr.bf16.mxu0 %v3708_v43 }
 0x6f4   :  { %2590 = vmatpush1.bf16.msra.mxu0 %v3706_v44 }
 0x78a   :  { %v2095_v31 = vpop.f32.mrb[32].mxu0 }
 0x78b   :  { %v2096_v32 = vadd.f32 %v2095_v31, %v1974_v29  ;;  %v2097_v33 = vpop.f32.mrb[33].mxu0 }
 0x78c   :  { %v2098_v34 = vadd.f32 %v2097_v33, %v1978_v30  ;;  %v2099_v35 = vpop.f32.mrb[34].mxu0 }
 0x78d   :  { %v2102_v36 = vmax.f32 %v2096_v32, 0.0  ;;  %v2100_v37 = vpop.f32.mrb[35].mxu0 }
 0x78e   :  { %v2103_v38 = vmax.f32 %v2098_v34, 0.0 }
 0x78f   :  { %v2104_v40 = vpack.c.bf16 %v2102_v36, %v2102_v36 }
 0x790   :  { %v2105_v39 = vpack.c.bf16 %v2103_v38, %v2103_v38 }
 0x792   :  { %2342 = vmatprep.mubr.bf16.mxu1 %v2105_v39 }
 0x793   :  { %2343 = vmatmul.mubr.bf16.vlgmr.msra.gmra.mrb[32].mxu1 %v2104_v40 }
 0x794   :  { %3302 = vmatpush3.bf16.msra.mxu1 %v3710_v46 }
 0x795   :  { %3303 = vmatprep.subr.bf16.mxu1 %v3711_v47 }
 0x798   :  { %3304 = vmatpush3.bf16.msra.mxu1 %v3712_v48 }
 0x799   :  { %3305 = vmatprep.subr.bf16.mxu1 %v3713_v49 }
 0x79c   :  { %3306 = vmatpush3.bf16.msra.mxu1 %v3714_v50 }
 0x79d   :  { %3307 = vmatprep.subr.bf16.mxu1 %v3715_v51 }
 0x7a0   :  { %3308 = vmatpush3.bf16.msra.mxu1 %v3716_v52 }
 0x7a1   :  { %3309 = vmatprep.subr.bf16.mxu1 %v3717_v53 }
 0x7a4   :  { %3310 = vmatpush3.bf16.msra.mxu1 %v3718_v54 }
 0x7a5   :  { %3311 = vmatprep.subr.bf16.mxu1 %v3719_v55 }
 0x7a8   :  { %3312 = vmatpush3.bf16.msra.mxu1 %v3720_v56 }
 0x7a9   :  { %3313 = vmatprep.subr.bf16.mxu1 %v3721_v5 }
 0x7ac   :  { %3314 = vmatpush3.bf16.msra.mxu1 %v3722_v7 }
 0x7ad   :  { %3315 = vmatprep.subr.bf16.mxu1 %v3723_v8 }
 0x7b0   :  { %3316 = vmatpush3.bf16.msra.mxu1 %v3724_v9 }
 0x866   :  { %v2344_v60 = vpop.f32.mrb[32].mxu1 }
 0x867   :  { %v2345_v61 = vadd.f32 %v2344_v60, %v2143_v58  ;;  %v2346_v62 = vpop.f32.mrb[33].mxu1 }
 0x868   :  { %v2347_v63 = vadd.f32 %v2346_v62, %v2147_v59  ;;  %v2348_v0 = vpop.f32.mrb[34].mxu1 }
 0x869   :  { %v2351_v1 = vmax.f32 %v2345_v61, 0.0  ;;  %v2349_v2 = vpop.f32.mrb[35].mxu1 }
 0x86a   :  { %v2352_v3 = vmax.f32 %v2347_v63, 0.0 }
 0x86b   :  { %v2353_v4 = vpack.c.bf16 %v2351_v1, %v2351_v1 }
 0x86c   :  { %v2354_v6 = vpack.c.bf16 %v2352_v3, %v2352_v3 }
 0x86e   :  { %2591 = vmatprep.mubr.bf16.mxu0 %v2354_v6 }
 0x86f   :  { %2592 = vmatmul.mubr.bf16.vlgmr.msra.gmra.mrb[36].mxu0 %v2353_v4 }
 0x942   :  { %v2593_v13 = vpop.f32.mrb[36].mxu0 }
 0x943   :  { %v2594_v14 = vadd.f32 %v2593_v13, %v2392_v11  ;;  %v2595_v15 = vpop.f32.mrb[37].mxu0 }
 0x944   :  { %v2596_v16 = vadd.f32 %v2595_v15, %v2396_v12  ;;  %v2597_v17 = vpop.f32.mrb[38].mxu0 }
 0x945   :  { %v2600_v18 = vmax.f32 %v2594_v14, 0.0  ;;  %v2598_v19 = vpop.f32.mrb[39].mxu0 }
 0x946   :  { %v2601_v20 = vmax.f32 %v2596_v16, 0.0 }
 0x947   :  { %v2602_v22 = vpack.c.bf16 %v2600_v18, %v2600_v18 }
 0x948   :  { %v2603_v21 = vpack.c.bf16 %v2601_v20, %v2601_v20 }
 0x94a   :  { %2771 = vmatprep.mubr.bf16.mxu1 %v2603_v21 }
 0x94b   :  { %2772 = vmatmul.mubr.bf16.vlgmr.msra.gmra.mrb[36].mxu1 %v2602_v22 }
 0xa1e   :  { %v3317_v23 = vpop.f32.mrb[36].mxu1 }
 0xa1f   :  { %v3318_v25 = vpop.f32.mrb[37].mxu1 }
 0xa20   :  { %v3319_v27 = vadd.f32 %v3318_v25, %v3317_v23  ;;  %v3320_v29 = vpop.f32.mrb[38].mxu1 }
 0xa21   :  { %v3321_v26 = vpop.f32.mrb[39].mxu1 }
 0xa22   :  { %v2774_v30 = vadd.f32 %v3319_v27, %v3010_v24 }
 0xa24   :  { %2779 = vst [vmem:[%s5007_s16] sm:$0xff] %v2774_v30 }
 0xa25   :  { %2784 = vsyncpa [#allocation3], 1 }
 0xa26   :  { %2785 = vsyncpa [#allocation5], 1 }
 0xa27   :  { %2786 = vsyncpa [#allocation8], 1 }
 0xa28   :  { %2787 = vsyncpa [#allocation11], 1 }
 0xa29   :  { %2788 = vsyncpa [#allocation14], 1 }
 0xa2a   :  { %2789 = vsyncpa [#allocation17], 1 }
 0xa2b   :  { %2790 = vsyncpa [#allocation20], 1 }

</bundles_post_ra>
